<compile_context>
chip_gen: v7x
topology: tpu7x:2x2x1
jax: 0.10.0
libtpu: 0.0.40
codegen_flags: <defaults>
</compile_context>

<pallas_src>
import numpy as np

import jax
import jax.numpy as jnp
from jax.experimental import pallas as pl
from jax.experimental.pallas import tpu as pltpu

EPS = 1e-5
NEG_SLOPE = 0.01  # torch.nn.LeakyReLU default negative_slope


# ---------------------------------------------------------------------------
# Fused Pallas kernel (whole network, single launch, no grid)
# ---------------------------------------------------------------------------
def _bn_train(y, gamma, beta):
    """Train-mode BatchNorm over all rows (= N*H*W) per channel, biased var,
    folded into one scale/shift (one mul + one add per element)."""
    mu = jnp.mean(y, axis=0, keepdims=True)
    var = jnp.mean((y - mu) ** 2, axis=0, keepdims=True)
    s = gamma * jax.lax.rsqrt(var + EPS)
    return y * s + (beta - mu * s)


def fused_kernel(p1_ref, w1_ref, s2_ref, w2_ref, r3_ref, w3_ref, pp_ref, o_ref):
    # pp_ref rows: 0=bn1_g 1=bn1_b 2=bn2_g 3=bn2_b 4=bn3_g 5=bn3_b 6=conv3_b
    # ---- stage 1: Conv1 (im2col matmul) + BN1 + LeakyReLU -------------------
    a1 = jnp.dot(p1_ref[...], w1_ref[...], preferred_element_type=jnp.float32)
    a1 = _bn_train(a1, pp_ref[0:1, 0:5], pp_ref[1:2, 0:5])
    a1 = jnp.maximum(a1, NEG_SLOPE * a1)                     # LeakyReLU

    # ---- stage 2: Conv2 as sum over 3x3 taps of (S_t @ A1) @ W2_t ----------
    #      (S_t are constant 0/1 row-selection matrices; zero rows == padding)
    n_taps = s2_ref.shape[0]
    acc2 = None
    for t in range(n_taps):
        g = jnp.dot(s2_ref[t], a1, preferred_element_type=jnp.float32)
        term = jnp.dot(g, w2_ref[t], preferred_element_type=jnp.float32)
        acc2 = term if acc2 is None else acc2 + term
    a2 = _bn_train(acc2, pp_ref[2:3, :], pp_ref[3:4, :])     # BN2
    a2 = jnp.maximum(a2, NEG_SLOPE * a2)                     # LeakyReLU
    a2 = _bn_train(a2, pp_ref[4:5, :], pp_ref[5:6, :])       # BN3

    # ---- stage 3 + adaptive avg pool (commuted before the conv) ------------
    #      pooled = sum_t (R_t @ A2) @ W3_t ; R_t already contains the 1/(H*W)
    acc3 = None
    for t in range(n_taps):
        g = jnp.dot(r3_ref[t], a2, preferred_element_type=jnp.float32)
        term = jnp.dot(g, w3_ref[t], preferred_element_type=jnp.float32)
        acc3 = term if acc3 is None else acc3 + term
    logits = acc3 + pp_ref[6:7, 0:3]                         # conv3 bias

    # softmax over the 3 channels
    m = jnp.max(logits, axis=-1, keepdims=True)
    e = jnp.exp(logits - m)
    probs = e * pl.reciprocal(jnp.sum(e, axis=-1, keepdims=True))
    o_ref[...] = probs[: o_ref.shape[0], :]                  # keep real batch rows


# ---------------------------------------------------------------------------
# Trace-time constant builders (numpy, static shapes only)
# ---------------------------------------------------------------------------
def _build_tap_select(n, h_in, w_in, h_out, w_out, k, stride, pad):
    """S[t] (M_out, M_in) 0/1: S[t] @ A gathers, per kernel tap t=(di*k+dj),
    the input row feeding each output position (all-zero row == zero pad)."""
    m_in, m_out = n * h_in * w_in, n * h_out * w_out
    s = np.zeros((k * k, m_out, m_in), np.float32)
    for di in range(k):
        for dj in range(k):
            t = di * k + dj
            for b in range(n):
                for ho in range(h_out):
                    hi = stride * ho + di - pad
                    if not 0 <= hi < h_in:
                        continue
                    for wo in range(w_out):
                        wi = stride * wo + dj - pad
                        if not 0 <= wi < w_in:
                            continue
                        s[t, (b * h_out + ho) * w_out + wo,
                             (b * h_in + hi) * w_in + wi] = 1.0
    return s


def _build_tap_pool(n, h_in, w_in, h_out, w_out, k, pad, rows_pad=8):
    """R[t] (rows_pad, M_in): sum_t (R[t] @ A) @ W_t == avg-pooled conv output.
    The pooling average (1/(h_out*w_out)) is folded in.  Rows n..rows_pad-1
    are zero (sublane-aligned padding of the tiny batch dimension)."""
    m_in = n * h_in * w_in
    r = np.zeros((k * k, rows_pad, m_in), np.float32)
    inv = 1.0 / float(h_out * w_out)
    for di in range(k):
        for dj in range(k):
            t = di * k + dj
            for b in range(n):
                for hi in range(h_in):
                    if not 0 <= hi - di + pad < h_out:
                        continue
                    for wi in range(w_in):
                        if not 0 <= wi - dj + pad < w_out:
                            continue
                        r[t, b, (b * h_in + hi) * w_in + wi] = inv
    return r


# ---------------------------------------------------------------------------
# Stage-1 im2col (pure layout work on the raw input, done once outside)
# ---------------------------------------------------------------------------
def _im2col_nchw(x, kh, kw, sh, sw, ph, pw):
    n, c, h, w = x.shape
    xp = jnp.pad(x, ((0, 0), (0, 0), (ph, ph), (pw, pw)))
    ho = (h + 2 * ph - kh) // sh + 1
    wo = (w + 2 * pw - kw) // sw + 1
    cols = [xp[:, :, i:i + sh * ho:sh, j:j + sw * wo:sw]
            for i in range(kh) for j in range(kw)]
    p = jnp.stack(cols, axis=2).reshape(n, c * kh * kw, ho, wo)  # torch col order
    p = p.transpose(0, 2, 3, 1).reshape(n * ho * wo, c * kh * kw)
    return p, ho, wo


# ---------------------------------------------------------------------------
# Full model forward: one fused pallas_call
# ---------------------------------------------------------------------------
@jax.jit
def model_forward(x, params):
    n = x.shape[0]
    assert n <= 8, "tiny-batch kernel: pooled rows are padded to 8 sublanes"

    # stage-1 patches (layout only; compute happens in the fused kernel)
    p1, h1, w1o = _im2col_nchw(x, 5, 5, 2, 2, 1, 1)
    w1mat = params["w1"].reshape(5, -1).T                        # (75, 5)

    h2o = (h1 + 2 - 3) // 2 + 1
    w2o = (w1o + 2 - 3) // 2 + 1
    h3o = (h2o + 2 - 3) // 1 + 1
    w3o = (w2o + 2 - 3) // 1 + 1

    # constant gather / pooled-gather matrices (baked at trace time)
    s2 = jnp.asarray(_build_tap_select(n, h1, w1o, h2o, w2o, 3, 2, 1))  # (9,M2,M1)
    r3 = jnp.asarray(_build_tap_pool(n, h2o, w2o, h3o, w3o, 3, 1))      # (9,8,M2)

    # per-tap weight slices:  W*[t, c_in, c_out] = torch_w[c_out, c_in, di, dj]
    w2stk = jnp.transpose(params["w2"], (2, 3, 1, 0)).reshape(9, 5, 8)
    w3stk = jnp.transpose(params["w3"], (2, 3, 1, 0)).reshape(9, 8, 3)

    # pack every tiny per-channel parameter into ONE (8, 8) array (one DMA).
    # conv biases b1/b2 are intentionally omitted: train-mode BN cancels them.
    def pad8(v):
        return jnp.pad(v, (0, 8 - v.shape[0]))
    pp = jnp.stack([pad8(params["bn1_g"]), pad8(params["bn1_b"]),
                    params["bn2_g"], params["bn2_b"],
                    params["bn3_g"], params["bn3_b"],
                    pad8(params["b3"]), jnp.zeros((8,), jnp.float32)])

    m1, m2 = p1.shape[0], s2.shape[1]
    flops = 2 * (m1 * 75 * 5
                 + 9 * (m2 * m1 * 5 + m2 * 5 * 8)
                 + 9 * (8 * m2 * 8 + 8 * 8 * 3))
    nbytes = 4 * (p1.size + w1mat.size + s2.size + w2stk.size
                  + r3.size + w3stk.size + pp.size + n * 3)

    vmem = pl.BlockSpec(memory_space=pltpu.MemorySpace.VMEM)
    return pl.pallas_call(
        fused_kernel,
        out_shape=jax.ShapeDtypeStruct((n, 3), jnp.float32),
        in_specs=[vmem] * 7,
        out_specs=vmem,
        cost_estimate=pl.CostEstimate(flops=flops, transcendentals=64,
                                      bytes_accessed=nbytes),
    )(p1, w1mat, s2, w2stk, r3, w3stk, pp)


# ---------------------------------------------------------------------------
# Pure-JAX reference (independent path: lax.conv) for self-check
# ---------------------------------------------------------------------------
def _ref_forward(x, params):
    hp = jax.lax.Precision.HIGHEST

    def conv(y, w, b, stride, pad):
        out = jax.lax.conv_general_dilated(
            y, w, window_strides=(stride, stride),
            padding=((pad, pad), (pad, pad)),
            dimension_numbers=("NCHW", "OIHW", "NCHW"), precision=hp)
        return out + b.reshape(1, -1, 1, 1)

    def bn(y, g, b):
        mu = jnp.mean(y, axis=(0, 2, 3), keepdims=True)
        var = jnp.mean((y - mu) ** 2, axis=(0, 2, 3), keepdims=True)
        return ((y - mu) * jax.lax.rsqrt(var + EPS) * g.reshape(1, -1, 1, 1)
                + b.reshape(1, -1, 1, 1))

    def lrelu(y):
        return jnp.where(y >= 0, y, NEG_SLOPE * y)

    y = lrelu(bn(conv(x, params["w1"], params["b1"], 2, 1),
                 params["bn1_g"], params["bn1_b"]))
    y = lrelu(bn(conv(y, params["w2"], params["b2"], 2, 1),
                 params["bn2_g"], params["bn2_b"]))
    y = bn(y, params["bn3_g"], params["bn3_b"])
    y = conv(y, params["w3"], params["b3"], 1, 1)
    y = jnp.mean(y, axis=(2, 3))
    return jax.nn.softmax(y, axis=1)


def init_params(key):
    ks = jax.random.split(key, 12)
    f32 = jnp.float32
    return {
        # conv weights use PyTorch layout (C_out, C_in, KH, KW)
        "w1": 0.1 * jax.random.normal(ks[0], (5, 3, 5, 5), f32),
        "b1": 0.05 * jax.random.normal(ks[1], (5,), f32),     # cancelled by BN1
        "bn1_g": 1.0 + 0.1 * jax.random.normal(ks[2], (5,), f32),
        "bn1_b": 0.05 * jax.random.normal(ks[3], (5,), f32),
        "w2": 0.1 * jax.random.normal(ks[4], (8, 5, 3, 3), f32),
        "b2": 0.05 * jax.random.normal(ks[5], (8,), f32),     # cancelled by BN2
        "bn2_g": 1.0 + 0.1 * jax.random.normal(ks[6], (8,), f32),
        "bn2_b": 0.05 * jax.random.normal(ks[7], (8,), f32),
        "bn3_g": 1.0 + 0.1 * jax.random.normal(ks[8], (8,), f32),
        "bn3_b": 0.05 * jax.random.normal(ks[9], (8,), f32),
        "w3": 0.1 * jax.random.normal(ks[10], (3, 8, 3, 3), f32),
        "b3": 0.05 * jax.random.normal(ks[11], (3,), f32),
    }


if __name__ == "__main__":
    key = jax.random.PRNGKey(0)
    pkey, xkey = jax.random.split(key)
    params = init_params(pkey)
    x = jax.random.normal(xkey, (2, 3, 16, 16), jnp.float32)   # NCHW, like PyTorch

    y = jax.block_until_ready(model_forward(x, params))
    y_ref = jax.block_until_ready(_ref_forward(x, params))

    assert y.shape == (2, 3)
    assert bool(jnp.all(jnp.isfinite(y)))
    assert bool(jnp.allclose(jnp.sum(y, axis=1), 1.0, atol=1e-5))  # softmax rows
    assert bool(jnp.allclose(y, y_ref, atol=5e-3)), (y, y_ref)     # vs lax.conv ref
    print("KERNEL_OK")
</pallas_src>

<mosaic_0001>
module attributes {stable_mosaic.version = 11 : i64} {
  func.func @fused_kernel(%arg0: memref<98x75xf32, #tpu.memory_space<vmem>>, %arg1: memref<75x5xf32, #tpu.memory_space<vmem>>, %arg2: memref<9x32x98xf32, #tpu.memory_space<vmem>>, %arg3: memref<9x5x8xf32, #tpu.memory_space<vmem>>, %arg4: memref<9x8x32xf32, #tpu.memory_space<vmem>>, %arg5: memref<9x8x3xf32, #tpu.memory_space<vmem>>, %arg6: memref<8x8xf32, #tpu.memory_space<vmem>>, %arg7: memref<2x3xf32, #tpu.memory_space<vmem>>) attributes {dimension_semantics = [], scalar_prefetch = 0 : i64, scratch_operands = 0 : i64, tpu.core_type = #tpu.core_type<tc>} {
    %c0 = arith.constant 0 : index
    %c0_0 = arith.constant 0 : index
    %0 = vector.load %arg0[%c0, %c0_0] : memref<98x75xf32, #tpu.memory_space<vmem>>, vector<98x75xf32>
    %c0_1 = arith.constant 0 : index
    %c0_2 = arith.constant 0 : index
    %1 = vector.load %arg1[%c0_1, %c0_2] : memref<75x5xf32, #tpu.memory_space<vmem>>, vector<75x5xf32>
    %cst = arith.constant dense<0.000000e+00> : vector<98x5xf32>
    %2 = tpu.matmul %0, %1, %cst {dimension_numbers = #tpu.dot_dimension_numbers<[1], [0], [0], [1], [0, 0, 1, 1], [], []>} : vector<98x75xf32>, vector<75x5xf32>, vector<98x5xf32> -> vector<98x5xf32>
    %c0_3 = arith.constant 0 : index
    %c0_4 = arith.constant 0 : index
    %3 = vector.load %arg6[%c0_3, %c0_4] : memref<8x8xf32, #tpu.memory_space<vmem>>, vector<1x5xf32>
    %c1 = arith.constant 1 : index
    %c0_5 = arith.constant 0 : index
    %4 = vector.load %arg6[%c1, %c0_5] : memref<8x8xf32, #tpu.memory_space<vmem>>, vector<1x5xf32>
    %cst_6 = arith.constant dense<0.000000e+00> : vector<5xf32>
    %5 = vector.multi_reduction <add>, %2, %cst_6 [0] : vector<98x5xf32> to vector<5xf32>
    %6 = vector.shape_cast %5 : vector<5xf32> to vector<1x5xf32>
    %cst_7 = arith.constant 9.800000e+01 : f32
    %7 = vector.broadcast %cst_7 : f32 to vector<1x5xf32>
    %8 = arith.divf %6, %7 : vector<1x5xf32>
    %9 = vector.broadcast %8 : vector<1x5xf32> to vector<98x5xf32>
    %10 = arith.subf %2, %9 : vector<98x5xf32>
    %11 = arith.mulf %10, %10 : vector<98x5xf32>
    %cst_8 = arith.constant dense<0.000000e+00> : vector<5xf32>
    %12 = vector.multi_reduction <add>, %11, %cst_8 [0] : vector<98x5xf32> to vector<5xf32>
    %13 = vector.shape_cast %12 : vector<5xf32> to vector<1x5xf32>
    %cst_9 = arith.constant 9.800000e+01 : f32
    %14 = vector.broadcast %cst_9 : f32 to vector<1x5xf32>
    %15 = arith.divf %13, %14 : vector<1x5xf32>
    %cst_10 = arith.constant 9.99999974E-6 : f32
    %16 = vector.broadcast %cst_10 : f32 to vector<1x5xf32>
    %17 = arith.addf %15, %16 : vector<1x5xf32>
    %18 = math.rsqrt %17 : vector<1x5xf32>
    %19 = arith.mulf %3, %18 : vector<1x5xf32>
    %20 = vector.broadcast %19 : vector<1x5xf32> to vector<98x5xf32>
    %21 = arith.mulf %2, %20 : vector<98x5xf32>
    %22 = arith.mulf %8, %19 : vector<1x5xf32>
    %23 = arith.subf %4, %22 : vector<1x5xf32>
    %24 = vector.broadcast %23 : vector<1x5xf32> to vector<98x5xf32>
    %25 = arith.addf %21, %24 : vector<98x5xf32>
    %cst_11 = arith.constant 0.00999999977 : f32
    %26 = vector.broadcast %cst_11 : f32 to vector<98x5xf32>
    %27 = arith.mulf %26, %25 : vector<98x5xf32>
    %28 = arith.maximumf %25, %27 : vector<98x5xf32>
    %c0_12 = arith.constant 0 : index
    %c0_13 = arith.constant 0 : index
    %c0_14 = arith.constant 0 : index
    %29 = vector.load %arg2[%c0_12, %c0_13, %c0_14] : memref<9x32x98xf32, #tpu.memory_space<vmem>>, vector<1x32x98xf32>
    %30 = vector.shape_cast %29 : vector<1x32x98xf32> to vector<32x98xf32>
    %cst_15 = arith.constant dense<0.000000e+00> : vector<32x5xf32>
    %31 = tpu.matmul %30, %28, %cst_15 {dimension_numbers = #tpu.dot_dimension_numbers<[1], [0], [0], [1], [0, 0, 1, 1], [], []>} : vector<32x98xf32>, vector<98x5xf32>, vector<32x5xf32> -> vector<32x5xf32>
    %c0_16 = arith.constant 0 : index
    %c0_17 = arith.constant 0 : index
    %c0_18 = arith.constant 0 : index
    %32 = vector.load %arg3[%c0_16, %c0_17, %c0_18] : memref<9x5x8xf32, #tpu.memory_space<vmem>>, vector<1x5x8xf32>
    %33 = vector.shape_cast %32 : vector<1x5x8xf32> to vector<5x8xf32>
    %cst_19 = arith.constant dense<0.000000e+00> : vector<32x8xf32>
    %34 = tpu.matmul %31, %33, %cst_19 {dimension_numbers = #tpu.dot_dimension_numbers<[1], [0], [0], [1], [0, 0, 1, 1], [], []>} : vector<32x5xf32>, vector<5x8xf32>, vector<32x8xf32> -> vector<32x8xf32>
    %c1_20 = arith.constant 1 : index
    %c0_21 = arith.constant 0 : index
    %c0_22 = arith.constant 0 : index
    %35 = vector.load %arg2[%c1_20, %c0_21, %c0_22] : memref<9x32x98xf32, #tpu.memory_space<vmem>>, vector<1x32x98xf32>
    %36 = vector.shape_cast %35 : vector<1x32x98xf32> to vector<32x98xf32>
    %cst_23 = arith.constant dense<0.000000e+00> : vector<32x5xf32>
    %37 = tpu.matmul %36, %28, %cst_23 {dimension_numbers = #tpu.dot_dimension_numbers<[1], [0], [0], [1], [0, 0, 1, 1], [], []>} : vector<32x98xf32>, vector<98x5xf32>, vector<32x5xf32> -> vector<32x5xf32>
    %c1_24 = arith.constant 1 : index
    %c0_25 = arith.constant 0 : index
    %c0_26 = arith.constant 0 : index
    %38 = vector.load %arg3[%c1_24, %c0_25, %c0_26] : memref<9x5x8xf32, #tpu.memory_space<vmem>>, vector<1x5x8xf32>
    %39 = vector.shape_cast %38 : vector<1x5x8xf32> to vector<5x8xf32>
    %cst_27 = arith.constant dense<0.000000e+00> : vector<32x8xf32>
    %40 = tpu.matmul %37, %39, %cst_27 {dimension_numbers = #tpu.dot_dimension_numbers<[1], [0], [0], [1], [0, 0, 1, 1], [], []>} : vector<32x5xf32>, vector<5x8xf32>, vector<32x8xf32> -> vector<32x8xf32>
    %41 = arith.addf %34, %40 : vector<32x8xf32>
    %c2 = arith.constant 2 : index
    %c0_28 = arith.constant 0 : index
    %c0_29 = arith.constant 0 : index
    %42 = vector.load %arg2[%c2, %c0_28, %c0_29] : memref<9x32x98xf32, #tpu.memory_space<vmem>>, vector<1x32x98xf32>
    %43 = vector.shape_cast %42 : vector<1x32x98xf32> to vector<32x98xf32>
    %cst_30 = arith.constant dense<0.000000e+00> : vector<32x5xf32>
    %44 = tpu.matmul %43, %28, %cst_30 {dimension_numbers = #tpu.dot_dimension_numbers<[1], [0], [0], [1], [0, 0, 1, 1], [], []>} : vector<32x98xf32>, vector<98x5xf32>, vector<32x5xf32> -> vector<32x5xf32>
    %c2_31 = arith.constant 2 : index
    %c0_32 = arith.constant 0 : index
    %c0_33 = arith.constant 0 : index
    %45 = vector.load %arg3[%c2_31, %c0_32, %c0_33] : memref<9x5x8xf32, #tpu.memory_space<vmem>>, vector<1x5x8xf32>
    %46 = vector.shape_cast %45 : vector<1x5x8xf32> to vector<5x8xf32>
    %cst_34 = arith.constant dense<0.000000e+00> : vector<32x8xf32>
    %47 = tpu.matmul %44, %46, %cst_34 {dimension_numbers = #tpu.dot_dimension_numbers<[1], [0], [0], [1], [0, 0, 1, 1], [], []>} : vector<32x5xf32>, vector<5x8xf32>, vector<32x8xf32> -> vector<32x8xf32>
    %48 = arith.addf %41, %47 : vector<32x8xf32>
    %c3 = arith.constant 3 : index
    %c0_35 = arith.constant 0 : index
    %c0_36 = arith.constant 0 : index
    %49 = vector.load %arg2[%c3, %c0_35, %c0_36] : memref<9x32x98xf32, #tpu.memory_space<vmem>>, vector<1x32x98xf32>
    %50 = vector.shape_cast %49 : vector<1x32x98xf32> to vector<32x98xf32>
    %cst_37 = arith.constant dense<0.000000e+00> : vector<32x5xf32>
    %51 = tpu.matmul %50, %28, %cst_37 {dimension_numbers = #tpu.dot_dimension_numbers<[1], [0], [0], [1], [0, 0, 1, 1], [], []>} : vector<32x98xf32>, vector<98x5xf32>, vector<32x5xf32> -> vector<32x5xf32>
    %c3_38 = arith.constant 3 : index
    %c0_39 = arith.constant 0 : index
    %c0_40 = arith.constant 0 : index
    %52 = vector.load %arg3[%c3_38, %c0_39, %c0_40] : memref<9x5x8xf32, #tpu.memory_space<vmem>>, vector<1x5x8xf32>
    %53 = vector.shape_cast %52 : vector<1x5x8xf32> to vector<5x8xf32>
    %cst_41 = arith.constant dense<0.000000e+00> : vector<32x8xf32>
    %54 = tpu.matmul %51, %53, %cst_41 {dimension_numbers = #tpu.dot_dimension_numbers<[1], [0], [0], [1], [0, 0, 1, 1], [], []>} : vector<32x5xf32>, vector<5x8xf32>, vector<32x8xf32> -> vector<32x8xf32>
    %55 = arith.addf %48, %54 : vector<32x8xf32>
    %c4 = arith.constant 4 : index
    %c0_42 = arith.constant 0 : index
    %c0_43 = arith.constant 0 : index
    %56 = vector.load %arg2[%c4, %c0_42, %c0_43] : memref<9x32x98xf32, #tpu.memory_space<vmem>>, vector<1x32x98xf32>
    %57 = vector.shape_cast %56 : vector<1x32x98xf32> to vector<32x98xf32>
    %cst_44 = arith.constant dense<0.000000e+00> : vector<32x5xf32>
    %58 = tpu.matmul %57, %28, %cst_44 {dimension_numbers = #tpu.dot_dimension_numbers<[1], [0], [0], [1], [0, 0, 1, 1], [], []>} : vector<32x98xf32>, vector<98x5xf32>, vector<32x5xf32> -> vector<32x5xf32>
    %c4_45 = arith.constant 4 : index
    %c0_46 = arith.constant 0 : index
    %c0_47 = arith.constant 0 : index
    %59 = vector.load %arg3[%c4_45, %c0_46, %c0_47] : memref<9x5x8xf32, #tpu.memory_space<vmem>>, vector<1x5x8xf32>
    %60 = vector.shape_cast %59 : vector<1x5x8xf32> to vector<5x8xf32>
    %cst_48 = arith.constant dense<0.000000e+00> : vector<32x8xf32>
    %61 = tpu.matmul %58, %60, %cst_48 {dimension_numbers = #tpu.dot_dimension_numbers<[1], [0], [0], [1], [0, 0, 1, 1], [], []>} : vector<32x5xf32>, vector<5x8xf32>, vector<32x8xf32> -> vector<32x8xf32>
    %62 = arith.addf %55, %61 : vector<32x8xf32>
    %c5 = arith.constant 5 : index
    %c0_49 = arith.constant 0 : index
    %c0_50 = arith.constant 0 : index
    %63 = vector.load %arg2[%c5, %c0_49, %c0_50] : memref<9x32x98xf32, #tpu.memory_space<vmem>>, vector<1x32x98xf32>
    %64 = vector.shape_cast %63 : vector<1x32x98xf32> to vector<32x98xf32>
    %cst_51 = arith.constant dense<0.000000e+00> : vector<32x5xf32>
    %65 = tpu.matmul %64, %28, %cst_51 {dimension_numbers = #tpu.dot_dimension_numbers<[1], [0], [0], [1], [0, 0, 1, 1], [], []>} : vector<32x98xf32>, vector<98x5xf32>, vector<32x5xf32> -> vector<32x5xf32>
    %c5_52 = arith.constant 5 : index
    %c0_53 = arith.constant 0 : index
    %c0_54 = arith.constant 0 : index
    %66 = vector.load %arg3[%c5_52, %c0_53, %c0_54] : memref<9x5x8xf32, #tpu.memory_space<vmem>>, vector<1x5x8xf32>
    %67 = vector.shape_cast %66 : vector<1x5x8xf32> to vector<5x8xf32>
    %cst_55 = arith.constant dense<0.000000e+00> : vector<32x8xf32>
    %68 = tpu.matmul %65, %67, %cst_55 {dimension_numbers = #tpu.dot_dimension_numbers<[1], [0], [0], [1], [0, 0, 1, 1], [], []>} : vector<32x5xf32>, vector<5x8xf32>, vector<32x8xf32> -> vector<32x8xf32>
    %69 = arith.addf %62, %68 : vector<32x8xf32>
    %c6 = arith.constant 6 : index
    %c0_56 = arith.constant 0 : index
    %c0_57 = arith.constant 0 : index
    %70 = vector.load %arg2[%c6, %c0_56, %c0_57] : memref<9x32x98xf32, #tpu.memory_space<vmem>>, vector<1x32x98xf32>
    %71 = vector.shape_cast %70 : vector<1x32x98xf32> to vector<32x98xf32>
    %cst_58 = arith.constant dense<0.000000e+00> : vector<32x5xf32>
    %72 = tpu.matmul %71, %28, %cst_58 {dimension_numbers = #tpu.dot_dimension_numbers<[1], [0], [0], [1], [0, 0, 1, 1], [], []>} : vector<32x98xf32>, vector<98x5xf32>, vector<32x5xf32> -> vector<32x5xf32>
    %c6_59 = arith.constant 6 : index
    %c0_60 = arith.constant 0 : index
    %c0_61 = arith.constant 0 : index
    %73 = vector.load %arg3[%c6_59, %c0_60, %c0_61] : memref<9x5x8xf32, #tpu.memory_space<vmem>>, vector<1x5x8xf32>
    %74 = vector.shape_cast %73 : vector<1x5x8xf32> to vector<5x8xf32>
    %cst_62 = arith.constant dense<0.000000e+00> : vector<32x8xf32>
    %75 = tpu.matmul %72, %74, %cst_62 {dimension_numbers = #tpu.dot_dimension_numbers<[1], [0], [0], [1], [0, 0, 1, 1], [], []>} : vector<32x5xf32>, vector<5x8xf32>, vector<32x8xf32> -> vector<32x8xf32>
    %76 = arith.addf %69, %75 : vector<32x8xf32>
    %c7 = arith.constant 7 : index
    %c0_63 = arith.constant 0 : index
    %c0_64 = arith.constant 0 : index
    %77 = vector.load %arg2[%c7, %c0_63, %c0_64] : memref<9x32x98xf32, #tpu.memory_space<vmem>>, vector<1x32x98xf32>
    %78 = vector.shape_cast %77 : vector<1x32x98xf32> to vector<32x98xf32>
    %cst_65 = arith.constant dense<0.000000e+00> : vector<32x5xf32>
    %79 = tpu.matmul %78, %28, %cst_65 {dimension_numbers = #tpu.dot_dimension_numbers<[1], [0], [0], [1], [0, 0, 1, 1], [], []>} : vector<32x98xf32>, vector<98x5xf32>, vector<32x5xf32> -> vector<32x5xf32>
    %c7_66 = arith.constant 7 : index
    %c0_67 = arith.constant 0 : index
    %c0_68 = arith.constant 0 : index
    %80 = vector.load %arg3[%c7_66, %c0_67, %c0_68] : memref<9x5x8xf32, #tpu.memory_space<vmem>>, vector<1x5x8xf32>
    %81 = vector.shape_cast %80 : vector<1x5x8xf32> to vector<5x8xf32>
    %cst_69 = arith.constant dense<0.000000e+00> : vector<32x8xf32>
    %82 = tpu.matmul %79, %81, %cst_69 {dimension_numbers = #tpu.dot_dimension_numbers<[1], [0], [0], [1], [0, 0, 1, 1], [], []>} : vector<32x5xf32>, vector<5x8xf32>, vector<32x8xf32> -> vector<32x8xf32>
    %83 = arith.addf %76, %82 : vector<32x8xf32>
    %c8 = arith.constant 8 : index
    %c0_70 = arith.constant 0 : index
    %c0_71 = arith.constant 0 : index
    %84 = vector.load %arg2[%c8, %c0_70, %c0_71] : memref<9x32x98xf32, #tpu.memory_space<vmem>>, vector<1x32x98xf32>
    %85 = vector.shape_cast %84 : vector<1x32x98xf32> to vector<32x98xf32>
    %cst_72 = arith.constant dense<0.000000e+00> : vector<32x5xf32>
    %86 = tpu.matmul %85, %28, %cst_72 {dimension_numbers = #tpu.dot_dimension_numbers<[1], [0], [0], [1], [0, 0, 1, 1], [], []>} : vector<32x98xf32>, vector<98x5xf32>, vector<32x5xf32> -> vector<32x5xf32>
    %c8_73 = arith.constant 8 : index
    %c0_74 = arith.constant 0 : index
    %c0_75 = arith.constant 0 : index
    %87 = vector.load %arg3[%c8_73, %c0_74, %c0_75] : memref<9x5x8xf32, #tpu.memory_space<vmem>>, vector<1x5x8xf32>
    %88 = vector.shape_cast %87 : vector<1x5x8xf32> to vector<5x8xf32>
    %cst_76 = arith.constant dense<0.000000e+00> : vector<32x8xf32>
    %89 = tpu.matmul %86, %88, %cst_76 {dimension_numbers = #tpu.dot_dimension_numbers<[1], [0], [0], [1], [0, 0, 1, 1], [], []>} : vector<32x5xf32>, vector<5x8xf32>, vector<32x8xf32> -> vector<32x8xf32>
    %90 = arith.addf %83, %89 : vector<32x8xf32>
    %c2_77 = arith.constant 2 : index
    %c0_78 = arith.constant 0 : index
    %91 = vector.load %arg6[%c2_77, %c0_78] : memref<8x8xf32, #tpu.memory_space<vmem>>, vector<1x8xf32>
    %c3_79 = arith.constant 3 : index
    %c0_80 = arith.constant 0 : index
    %92 = vector.load %arg6[%c3_79, %c0_80] : memref<8x8xf32, #tpu.memory_space<vmem>>, vector<1x8xf32>
    %cst_81 = arith.constant dense<0.000000e+00> : vector<8xf32>
    %93 = vector.multi_reduction <add>, %90, %cst_81 [0] : vector<32x8xf32> to vector<8xf32>
    %94 = vector.shape_cast %93 : vector<8xf32> to vector<1x8xf32>
    %cst_82 = arith.constant 3.200000e+01 : f32
    %95 = vector.broadcast %cst_82 : f32 to vector<1x8xf32>
    %96 = arith.divf %94, %95 : vector<1x8xf32>
    %97 = vector.broadcast %96 : vector<1x8xf32> to vector<32x8xf32>
    %98 = arith.subf %90, %97 : vector<32x8xf32>
    %99 = arith.mulf %98, %98 : vector<32x8xf32>
    %cst_83 = arith.constant dense<0.000000e+00> : vector<8xf32>
    %100 = vector.multi_reduction <add>, %99, %cst_83 [0] : vector<32x8xf32> to vector<8xf32>
    %101 = vector.shape_cast %100 : vector<8xf32> to vector<1x8xf32>
    %cst_84 = arith.constant 3.200000e+01 : f32
    %102 = vector.broadcast %cst_84 : f32 to vector<1x8xf32>
    %103 = arith.divf %101, %102 : vector<1x8xf32>
    %cst_85 = arith.constant 9.99999974E-6 : f32
    %104 = vector.broadcast %cst_85 : f32 to vector<1x8xf32>
    %105 = arith.addf %103, %104 : vector<1x8xf32>
    %106 = math.rsqrt %105 : vector<1x8xf32>
    %107 = arith.mulf %91, %106 : vector<1x8xf32>
    %108 = vector.broadcast %107 : vector<1x8xf32> to vector<32x8xf32>
    %109 = arith.mulf %90, %108 : vector<32x8xf32>
    %110 = arith.mulf %96, %107 : vector<1x8xf32>
    %111 = arith.subf %92, %110 : vector<1x8xf32>
    %112 = vector.broadcast %111 : vector<1x8xf32> to vector<32x8xf32>
    %113 = arith.addf %109, %112 : vector<32x8xf32>
    %cst_86 = arith.constant 0.00999999977 : f32
    %114 = vector.broadcast %cst_86 : f32 to vector<32x8xf32>
    %115 = arith.mulf %114, %113 : vector<32x8xf32>
    %116 = arith.maximumf %113, %115 : vector<32x8xf32>
    %c4_87 = arith.constant 4 : index
    %c0_88 = arith.constant 0 : index
    %117 = vector.load %arg6[%c4_87, %c0_88] : memref<8x8xf32, #tpu.memory_space<vmem>>, vector<1x8xf32>
    %c5_89 = arith.constant 5 : index
    %c0_90 = arith.constant 0 : index
    %118 = vector.load %arg6[%c5_89, %c0_90] : memref<8x8xf32, #tpu.memory_space<vmem>>, vector<1x8xf32>
    %cst_91 = arith.constant dense<0.000000e+00> : vector<8xf32>
    %119 = vector.multi_reduction <add>, %116, %cst_91 [0] : vector<32x8xf32> to vector<8xf32>
    %120 = vector.shape_cast %119 : vector<8xf32> to vector<1x8xf32>
    %cst_92 = arith.constant 3.200000e+01 : f32
    %121 = vector.broadcast %cst_92 : f32 to vector<1x8xf32>
    %122 = arith.divf %120, %121 : vector<1x8xf32>
    %123 = vector.broadcast %122 : vector<1x8xf32> to vector<32x8xf32>
    %124 = arith.subf %116, %123 : vector<32x8xf32>
    %125 = arith.mulf %124, %124 : vector<32x8xf32>
    %cst_93 = arith.constant dense<0.000000e+00> : vector<8xf32>
    %126 = vector.multi_reduction <add>, %125, %cst_93 [0] : vector<32x8xf32> to vector<8xf32>
    %127 = vector.shape_cast %126 : vector<8xf32> to vector<1x8xf32>
    %cst_94 = arith.constant 3.200000e+01 : f32
    %128 = vector.broadcast %cst_94 : f32 to vector<1x8xf32>
    %129 = arith.divf %127, %128 : vector<1x8xf32>
    %cst_95 = arith.constant 9.99999974E-6 : f32
    %130 = vector.broadcast %cst_95 : f32 to vector<1x8xf32>
    %131 = arith.addf %129, %130 : vector<1x8xf32>
    %132 = math.rsqrt %131 : vector<1x8xf32>
    %133 = arith.mulf %117, %132 : vector<1x8xf32>
    %134 = vector.broadcast %133 : vector<1x8xf32> to vector<32x8xf32>
    %135 = arith.mulf %116, %134 : vector<32x8xf32>
    %136 = arith.mulf %122, %133 : vector<1x8xf32>
    %137 = arith.subf %118, %136 : vector<1x8xf32>
    %138 = vector.broadcast %137 : vector<1x8xf32> to vector<32x8xf32>
    %139 = arith.addf %135, %138 : vector<32x8xf32>
    %c0_96 = arith.constant 0 : index
    %c0_97 = arith.constant 0 : index
    %c0_98 = arith.constant 0 : index
    %140 = vector.load %arg4[%c0_96, %c0_97, %c0_98] : memref<9x8x32xf32, #tpu.memory_space<vmem>>, vector<1x8x32xf32>
    %141 = vector.shape_cast %140 : vector<1x8x32xf32> to vector<8x32xf32>
    %cst_99 = arith.constant dense<0.000000e+00> : vector<8x8xf32>
    %142 = tpu.matmul %141, %139, %cst_99 {dimension_numbers = #tpu.dot_dimension_numbers<[1], [0], [0], [1], [0, 0, 1, 1], [], []>} : vector<8x32xf32>, vector<32x8xf32>, vector<8x8xf32> -> vector<8x8xf32>
    %c0_100 = arith.constant 0 : index
    %c0_101 = arith.constant 0 : index
    %c0_102 = arith.constant 0 : index
    %143 = vector.load %arg5[%c0_100, %c0_101, %c0_102] : memref<9x8x3xf32, #tpu.memory_space<vmem>>, vector<1x8x3xf32>
    %144 = vector.shape_cast %143 : vector<1x8x3xf32> to vector<8x3xf32>
    %cst_103 = arith.constant dense<0.000000e+00> : vector<8x3xf32>
    %145 = tpu.matmul %142, %144, %cst_103 {dimension_numbers = #tpu.dot_dimension_numbers<[1], [0], [0], [1], [0, 0, 1, 1], [], []>} : vector<8x8xf32>, vector<8x3xf32>, vector<8x3xf32> -> vector<8x3xf32>
    %c1_104 = arith.constant 1 : index
    %c0_105 = arith.constant 0 : index
    %c0_106 = arith.constant 0 : index
    %146 = vector.load %arg4[%c1_104, %c0_105, %c0_106] : memref<9x8x32xf32, #tpu.memory_space<vmem>>, vector<1x8x32xf32>
    %147 = vector.shape_cast %146 : vector<1x8x32xf32> to vector<8x32xf32>
    %cst_107 = arith.constant dense<0.000000e+00> : vector<8x8xf32>
    %148 = tpu.matmul %147, %139, %cst_107 {dimension_numbers = #tpu.dot_dimension_numbers<[1], [0], [0], [1], [0, 0, 1, 1], [], []>} : vector<8x32xf32>, vector<32x8xf32>, vector<8x8xf32> -> vector<8x8xf32>
    %c1_108 = arith.constant 1 : index
    %c0_109 = arith.constant 0 : index
    %c0_110 = arith.constant 0 : index
    %149 = vector.load %arg5[%c1_108, %c0_109, %c0_110] : memref<9x8x3xf32, #tpu.memory_space<vmem>>, vector<1x8x3xf32>
    %150 = vector.shape_cast %149 : vector<1x8x3xf32> to vector<8x3xf32>
    %cst_111 = arith.constant dense<0.000000e+00> : vector<8x3xf32>
    %151 = tpu.matmul %148, %150, %cst_111 {dimension_numbers = #tpu.dot_dimension_numbers<[1], [0], [0], [1], [0, 0, 1, 1], [], []>} : vector<8x8xf32>, vector<8x3xf32>, vector<8x3xf32> -> vector<8x3xf32>
    %152 = arith.addf %145, %151 : vector<8x3xf32>
    %c2_112 = arith.constant 2 : index
    %c0_113 = arith.constant 0 : index
    %c0_114 = arith.constant 0 : index
    %153 = vector.load %arg4[%c2_112, %c0_113, %c0_114] : memref<9x8x32xf32, #tpu.memory_space<vmem>>, vector<1x8x32xf32>
    %154 = vector.shape_cast %153 : vector<1x8x32xf32> to vector<8x32xf32>
    %cst_115 = arith.constant dense<0.000000e+00> : vector<8x8xf32>
    %155 = tpu.matmul %154, %139, %cst_115 {dimension_numbers = #tpu.dot_dimension_numbers<[1], [0], [0], [1], [0, 0, 1, 1], [], []>} : vector<8x32xf32>, vector<32x8xf32>, vector<8x8xf32> -> vector<8x8xf32>
    %c2_116 = arith.constant 2 : index
    %c0_117 = arith.constant 0 : index
    %c0_118 = arith.constant 0 : index
    %156 = vector.load %arg5[%c2_116, %c0_117, %c0_118] : memref<9x8x3xf32, #tpu.memory_space<vmem>>, vector<1x8x3xf32>
    %157 = vector.shape_cast %156 : vector<1x8x3xf32> to vector<8x3xf32>
    %cst_119 = arith.constant dense<0.000000e+00> : vector<8x3xf32>
    %158 = tpu.matmul %155, %157, %cst_119 {dimension_numbers = #tpu.dot_dimension_numbers<[1], [0], [0], [1], [0, 0, 1, 1], [], []>} : vector<8x8xf32>, vector<8x3xf32>, vector<8x3xf32> -> vector<8x3xf32>
    %159 = arith.addf %152, %158 : vector<8x3xf32>
    %c3_120 = arith.constant 3 : index
    %c0_121 = arith.constant 0 : index
    %c0_122 = arith.constant 0 : index
    %160 = vector.load %arg4[%c3_120, %c0_121, %c0_122] : memref<9x8x32xf32, #tpu.memory_space<vmem>>, vector<1x8x32xf32>
    %161 = vector.shape_cast %160 : vector<1x8x32xf32> to vector<8x32xf32>
    %cst_123 = arith.constant dense<0.000000e+00> : vector<8x8xf32>
    %162 = tpu.matmul %161, %139, %cst_123 {dimension_numbers = #tpu.dot_dimension_numbers<[1], [0], [0], [1], [0, 0, 1, 1], [], []>} : vector<8x32xf32>, vector<32x8xf32>, vector<8x8xf32> -> vector<8x8xf32>
    %c3_124 = arith.constant 3 : index
    %c0_125 = arith.constant 0 : index
    %c0_126 = arith.constant 0 : index
    %163 = vector.load %arg5[%c3_124, %c0_125, %c0_126] : memref<9x8x3xf32, #tpu.memory_space<vmem>>, vector<1x8x3xf32>
    %164 = vector.shape_cast %163 : vector<1x8x3xf32> to vector<8x3xf32>
    %cst_127 = arith.constant dense<0.000000e+00> : vector<8x3xf32>
    %165 = tpu.matmul %162, %164, %cst_127 {dimension_numbers = #tpu.dot_dimension_numbers<[1], [0], [0], [1], [0, 0, 1, 1], [], []>} : vector<8x8xf32>, vector<8x3xf32>, vector<8x3xf32> -> vector<8x3xf32>
    %166 = arith.addf %159, %165 : vector<8x3xf32>
    %c4_128 = arith.constant 4 : index
    %c0_129 = arith.constant 0 : index
    %c0_130 = arith.constant 0 : index
    %167 = vector.load %arg4[%c4_128, %c0_129, %c0_130] : memref<9x8x32xf32, #tpu.memory_space<vmem>>, vector<1x8x32xf32>
    %168 = vector.shape_cast %167 : vector<1x8x32xf32> to vector<8x32xf32>
    %cst_131 = arith.constant dense<0.000000e+00> : vector<8x8xf32>
    %169 = tpu.matmul %168, %139, %cst_131 {dimension_numbers = #tpu.dot_dimension_numbers<[1], [0], [0], [1], [0, 0, 1, 1], [], []>} : vector<8x32xf32>, vector<32x8xf32>, vector<8x8xf32> -> vector<8x8xf32>
    %c4_132 = arith.constant 4 : index
    %c0_133 = arith.constant 0 : index
    %c0_134 = arith.constant 0 : index
    %170 = vector.load %arg5[%c4_132, %c0_133, %c0_134] : memref<9x8x3xf32, #tpu.memory_space<vmem>>, vector<1x8x3xf32>
    %171 = vector.shape_cast %170 : vector<1x8x3xf32> to vector<8x3xf32>
    %cst_135 = arith.constant dense<0.000000e+00> : vector<8x3xf32>
    %172 = tpu.matmul %169, %171, %cst_135 {dimension_numbers = #tpu.dot_dimension_numbers<[1], [0], [0], [1], [0, 0, 1, 1], [], []>} : vector<8x8xf32>, vector<8x3xf32>, vector<8x3xf32> -> vector<8x3xf32>
    %173 = arith.addf %166, %172 : vector<8x3xf32>
    %c5_136 = arith.constant 5 : index
    %c0_137 = arith.constant 0 : index
    %c0_138 = arith.constant 0 : index
    %174 = vector.load %arg4[%c5_136, %c0_137, %c0_138] : memref<9x8x32xf32, #tpu.memory_space<vmem>>, vector<1x8x32xf32>
    %175 = vector.shape_cast %174 : vector<1x8x32xf32> to vector<8x32xf32>
    %cst_139 = arith.constant dense<0.000000e+00> : vector<8x8xf32>
    %176 = tpu.matmul %175, %139, %cst_139 {dimension_numbers = #tpu.dot_dimension_numbers<[1], [0], [0], [1], [0, 0, 1, 1], [], []>} : vector<8x32xf32>, vector<32x8xf32>, vector<8x8xf32> -> vector<8x8xf32>
    %c5_140 = arith.constant 5 : index
    %c0_141 = arith.constant 0 : index
    %c0_142 = arith.constant 0 : index
    %177 = vector.load %arg5[%c5_140, %c0_141, %c0_142] : memref<9x8x3xf32, #tpu.memory_space<vmem>>, vector<1x8x3xf32>
    %178 = vector.shape_cast %177 : vector<1x8x3xf32> to vector<8x3xf32>
    %cst_143 = arith.constant dense<0.000000e+00> : vector<8x3xf32>
    %179 = tpu.matmul %176, %178, %cst_143 {dimension_numbers = #tpu.dot_dimension_numbers<[1], [0], [0], [1], [0, 0, 1, 1], [], []>} : vector<8x8xf32>, vector<8x3xf32>, vector<8x3xf32> -> vector<8x3xf32>
    %180 = arith.addf %173, %179 : vector<8x3xf32>
    %c6_144 = arith.constant 6 : index
    %c0_145 = arith.constant 0 : index
    %c0_146 = arith.constant 0 : index
    %181 = vector.load %arg4[%c6_144, %c0_145, %c0_146] : memref<9x8x32xf32, #tpu.memory_space<vmem>>, vector<1x8x32xf32>
    %182 = vector.shape_cast %181 : vector<1x8x32xf32> to vector<8x32xf32>
    %cst_147 = arith.constant dense<0.000000e+00> : vector<8x8xf32>
    %183 = tpu.matmul %182, %139, %cst_147 {dimension_numbers = #tpu.dot_dimension_numbers<[1], [0], [0], [1], [0, 0, 1, 1], [], []>} : vector<8x32xf32>, vector<32x8xf32>, vector<8x8xf32> -> vector<8x8xf32>
    %c6_148 = arith.constant 6 : index
    %c0_149 = arith.constant 0 : index
    %c0_150 = arith.constant 0 : index
    %184 = vector.load %arg5[%c6_148, %c0_149, %c0_150] : memref<9x8x3xf32, #tpu.memory_space<vmem>>, vector<1x8x3xf32>
    %185 = vector.shape_cast %184 : vector<1x8x3xf32> to vector<8x3xf32>
    %cst_151 = arith.constant dense<0.000000e+00> : vector<8x3xf32>
    %186 = tpu.matmul %183, %185, %cst_151 {dimension_numbers = #tpu.dot_dimension_numbers<[1], [0], [0], [1], [0, 0, 1, 1], [], []>} : vector<8x8xf32>, vector<8x3xf32>, vector<8x3xf32> -> vector<8x3xf32>
    %187 = arith.addf %180, %186 : vector<8x3xf32>
    %c7_152 = arith.constant 7 : index
    %c0_153 = arith.constant 0 : index
    %c0_154 = arith.constant 0 : index
    %188 = vector.load %arg4[%c7_152, %c0_153, %c0_154] : memref<9x8x32xf32, #tpu.memory_space<vmem>>, vector<1x8x32xf32>
    %189 = vector.shape_cast %188 : vector<1x8x32xf32> to vector<8x32xf32>
    %cst_155 = arith.constant dense<0.000000e+00> : vector<8x8xf32>
    %190 = tpu.matmul %189, %139, %cst_155 {dimension_numbers = #tpu.dot_dimension_numbers<[1], [0], [0], [1], [0, 0, 1, 1], [], []>} : vector<8x32xf32>, vector<32x8xf32>, vector<8x8xf32> -> vector<8x8xf32>
    %c7_156 = arith.constant 7 : index
    %c0_157 = arith.constant 0 : index
    %c0_158 = arith.constant 0 : index
    %191 = vector.load %arg5[%c7_156, %c0_157, %c0_158] : memref<9x8x3xf32, #tpu.memory_space<vmem>>, vector<1x8x3xf32>
    %192 = vector.shape_cast %191 : vector<1x8x3xf32> to vector<8x3xf32>
    %cst_159 = arith.constant dense<0.000000e+00> : vector<8x3xf32>
    %193 = tpu.matmul %190, %192, %cst_159 {dimension_numbers = #tpu.dot_dimension_numbers<[1], [0], [0], [1], [0, 0, 1, 1], [], []>} : vector<8x8xf32>, vector<8x3xf32>, vector<8x3xf32> -> vector<8x3xf32>
    %194 = arith.addf %187, %193 : vector<8x3xf32>
    %c8_160 = arith.constant 8 : index
    %c0_161 = arith.constant 0 : index
    %c0_162 = arith.constant 0 : index
    %195 = vector.load %arg4[%c8_160, %c0_161, %c0_162] : memref<9x8x32xf32, #tpu.memory_space<vmem>>, vector<1x8x32xf32>
    %196 = vector.shape_cast %195 : vector<1x8x32xf32> to vector<8x32xf32>
    %cst_163 = arith.constant dense<0.000000e+00> : vector<8x8xf32>
    %197 = tpu.matmul %196, %139, %cst_163 {dimension_numbers = #tpu.dot_dimension_numbers<[1], [0], [0], [1], [0, 0, 1, 1], [], []>} : vector<8x32xf32>, vector<32x8xf32>, vector<8x8xf32> -> vector<8x8xf32>
    %c8_164 = arith.constant 8 : index
    %c0_165 = arith.constant 0 : index
    %c0_166 = arith.constant 0 : index
    %198 = vector.load %arg5[%c8_164, %c0_165, %c0_166] : memref<9x8x3xf32, #tpu.memory_space<vmem>>, vector<1x8x3xf32>
    %199 = vector.shape_cast %198 : vector<1x8x3xf32> to vector<8x3xf32>
    %cst_167 = arith.constant dense<0.000000e+00> : vector<8x3xf32>
    %200 = tpu.matmul %197, %199, %cst_167 {dimension_numbers = #tpu.dot_dimension_numbers<[1], [0], [0], [1], [0, 0, 1, 1], [], []>} : vector<8x8xf32>, vector<8x3xf32>, vector<8x3xf32> -> vector<8x3xf32>
    %201 = arith.addf %194, %200 : vector<8x3xf32>
    %c6_168 = arith.constant 6 : index
    %c0_169 = arith.constant 0 : index
    %202 = vector.load %arg6[%c6_168, %c0_169] : memref<8x8xf32, #tpu.memory_space<vmem>>, vector<1x3xf32>
    %203 = vector.broadcast %202 : vector<1x3xf32> to vector<8x3xf32>
    %204 = arith.addf %201, %203 : vector<8x3xf32>
    %cst_170 = arith.constant dense<0xFF800000> : vector<8xf32>
    %205 = vector.multi_reduction <maximumf>, %204, %cst_170 [1] : vector<8x3xf32> to vector<8xf32>
    %206 = vector.shape_cast %205 : vector<8xf32> to vector<8x1xf32>
    %207 = vector.broadcast %206 : vector<8x1xf32> to vector<8x3xf32>
    %208 = arith.subf %204, %207 : vector<8x3xf32>
    %209 = math.exp %208 : vector<8x3xf32>
    %cst_171 = arith.constant dense<0.000000e+00> : vector<8xf32>
    %210 = vector.multi_reduction <add>, %209, %cst_171 [1] : vector<8x3xf32> to vector<8xf32>
    %211 = vector.shape_cast %210 : vector<8xf32> to vector<8x1xf32>
    %212 = tpu.reciprocal %211 : vector<8x1xf32> -> vector<8x1xf32>
    %213 = vector.broadcast %212 : vector<8x1xf32> to vector<8x3xf32>
    %214 = arith.mulf %209, %213 : vector<8x3xf32>
    %215 = vector.extract_strided_slice %214 {offsets = [0, 0], sizes = [2, 3], strides = [1, 1]} : vector<8x3xf32> to vector<2x3xf32>
    %c0_172 = arith.constant 0 : index
    %c0_173 = arith.constant 0 : index
    %216 = vector.load %arg7[%c0_172, %c0_173] : memref<2x3xf32, #tpu.memory_space<vmem>>, vector<2x3xf32>
    tpu.vector_store %arg7[%c0_172, %c0_173], %215 {strides = array<i32>} : memref<2x3xf32, #tpu.memory_space<vmem>>, vector<2x3xf32>,
    return
  }
}

</mosaic_0001>

<bundles_post_ra>
// kernel: model_forward.1
= control target key start
LH: loop header
LB: loop body
LE: loop exit
PB: predicated region body
PF: predicated region fallthrough
CT: control target
= control target key end

     0   :  { %v5153_v3 = vmov 0.0|0.0   ;;  %vm5154_vm0 = vmmov 0   ;;  %v5155_v6 = vmov 0.0   ;;  %s6015_s0 = inlined_call_operand.vmem [shape: f32[98,75], index: 0, kind: input, shape index: {}]   ;;  %s6016_s1 = inlined_call_operand.vmem [shape: f32[75,5], index: 1, kind: input, shape index: {}]   ;;  %s6017_s2 = inlined_call_operand.vmem [shape: f32[9,32,98], index: 2, kind: input, shape index: {}]   ;;  %s6018_s3 = inlined_call_operand.vmem [shape: f32[9,5,8], index: 3, kind: input, shape index: {}]   ;;  %s6019_s4 = inlined_call_operand.vmem [shape: f32[9,8,32], index: 4, kind: input, shape index: {}]   ;;  %s6020_s5 = inlined_call_operand.vmem [shape: f32[9,8,3], index: 5, kind: input, shape index: {}]   ;;  %s6021_s6 = inlined_call_operand.vmem [shape: f32[8,8], index: 6, kind: input, shape index: {}]   ;;  %s6022_s7 = inlined_call_operand.hbm [shape: f32[2,3], index: 7, kind: output, shape index: {}]  }
   0x1   :  { %v40_v0 = vld [vmem:[%s6016_s1] sm:$0xff]  ;;  %v41_v1 = vld [vmem:[%s6016_s1 + $0x8] sm:$0xff]  ;;  %v42_v2 = vld [vmem:[%s6016_s1 + $0x10] sm:$0xff]  ;;  %4796 = vmatprep.subr.bf16.mxu0 %v5153_v3  ;;  %4253 = vmatprep.mubr.msk.f32.mxu0 %vm5154_vm0, %v5155_v6 }
   0x2   :  { %v4797_v4 = vpack.c.bf16 %v41_v1, %v40_v0  ;;  %v43_v5 = vld [vmem:[%s6016_s1 + $0x18] sm:$0xff]  ;;  %v44_v8 = vld [vmem:[%s6016_s1 + $0x20] sm:$0xff]  ;;  %v45_v9 = vld [vmem:[%s6016_s1 + $0x28] sm:$0xff] }
   0x3   :  { %v4800_v7 = vpack.c.bf16 %v43_v5, %v42_v2  ;;  %v4803_v10 = vpack.c.bf16 %v45_v9, %v44_v8  ;;  %v46_v11 = vld [vmem:[%s6016_s1 + $0x30] sm:$0xff]  ;;  %v47_v12 = vld [vmem:[%s6016_s1 + $0x38] sm:$0xff] }
   0x4   :  { %4798 = vmatpush3.bf16.msra.mxu0 %v4797_v4 }
   0x5   :  { %4799 = vmatprep.subr.bf16.mxu0 %v5153_v3 }
   0x8   :  { %4801 = vmatpush3.bf16.msra.mxu0 %v4800_v7 }
   0x9   :  { %4802 = vmatprep.subr.bf16.mxu0 %v5153_v3 }
   0xa   :  { %12 = vsyncpa [#allocation3], 0  ;;  %v4806_v13 = vpack.c.bf16 %v47_v12, %v46_v11  ;;  %v48_v14 = vld [vmem:[%s6016_s1 + $0x40] sm:$0xff]  ;;  %v49_v15 = vld [vmem:[%s6016_s1 + $0x48] sm:$0x7]  ;;  %vm90_vm1 = vcmask 1042432  }
   0xb   :  { %v4809_v16 = vpack.c.bf16 %v49_v15, %v48_v14  ;;  %vm5156_vm2 = vmmov 1   ;;  %v27_v17 = vld [vmem:[%s6015_s0] sm:$0xff]  ;;  %vm50_vm4 = vcmask 613376   ;;  %v28_v18 = vld [vmem:[%s6015_s0 + $0x8] sm:$0xff]  ;;  %v29_v19 = vld [vmem:[%s6015_s0 + $0x10] sm:$0xff]  ;;  %vm226_vm5 = vcmask 39936  }
   0xc   :  { %4804 = vmatpush3.bf16.msra.mxu0 %v4803_v10  ;;  %vm4810_vm3 = vmpackc.low %vm90_vm1, %vm5156_vm2  ;;  %v30_v20 = vld [vmem:[%s6015_s0 + $0x18] sm:$0xff]  ;;  %v31_v21 = vld [vmem:[%s6015_s0 + $0x20] sm:$0xff]  ;;  %vm388_vm6 = vcmask 801792   ;;  %vm250_vm7 = vcmask 33792   ;;  %vm401_vm8 = vcmask 1041408   ;;  %vm607_vm9 = vcmask 1044480  }
   0xd   :  { %4805 = vmatprep.subr.bf16.mxu0 %v5153_v3  ;;  %v32_v22 = vld [vmem:[%s6015_s0 + $0x28] sm:$0xff]  ;;  %v33_v23 = vld [vmem:[%s6015_s0 + $0x30] sm:$0xff]  ;;  %v34_v24 = vld [vmem:[%s6015_s0 + $0x38] sm:$0xff]  ;;  %vm2254_vm10 = vcmask 64512   ;;  %vm2381_vm11 = vcmask 261120   ;;  %vm3742_vm12 = vcmask 23552  }
   0xe   :  { %v35_v25 = vld [vmem:[%s6015_s0 + $0x40] sm:$0xff]  ;;  %v36_v26 = vld [vmem:[%s6015_s0 + $0x48] sm:$0xff]  ;;  %v37_v27 = vld [vmem:[%s6015_s0 + $0x50] sm:$0xff]  ;;  %vm3754_vm13 = vcmask 17408  }
   0xf   :  { %v38_v28 = vld [vmem:[%s6015_s0 + $0x58] sm:$0xff]  ;;  %v39_v29 = vld [vmem:[%s6015_s0 + $0x60] sm:$0x3] }
  0x10   :  { %4807 = vmatpush3.bf16.msra.mxu0 %v4806_v13  ;;  %v384_v12 = vld [vmem:[%s6017_s2] sm:$0xff] }
  0x11   :  { %4808 = vmatprep.subr.bf16.mxu0 %v5153_v3  ;;  %4318 = vmatprep.mubr.msk.f32.mxu1 %vm388_vm6, %v384_v12  ;;  %v3809_v15 = vld [vmem:[%s6017_s2 + $0x40] sm:$0xff] }
  0x14   :  { %4811 = vmatpush3.bf16.msk.msra.mxu0 %vm4810_vm3, %v4809_v16 }
  0x17   :  { %4254 = vmatmul.mubr.msk.f32.vlgmr.msra.gmra.mrb[0].mxu0 %vm50_vm4, %v27_v17 }
  0x18   :  { %4256 = vmatprep.mubr.msk.f32.mxu0 %vm5154_vm0, %v5155_v6 }
  0x1b   :  { %4257 = vmatmul.mubr.msk.f32.gmra.mrb[2].mxu0 %vm50_vm4, %v28_v18 }
  0x1c   :  { %4259 = vmatprep.mubr.msk.f32.mxu0 %vm5154_vm0, %v5155_v6 }
  0x1f   :  { %4260 = vmatmul.mubr.msk.f32.gmra.mrb[4].mxu0 %vm50_vm4, %v29_v19 }
  0x20   :  { %4262 = vmatprep.mubr.msk.f32.mxu0 %vm5154_vm0, %v5155_v6 }
  0x23   :  { %4263 = vmatmul.mubr.msk.f32.gmra.mrb[6].mxu0 %vm50_vm4, %v30_v20 }
  0x24   :  { %4265 = vmatprep.mubr.msk.f32.mxu0 %vm5154_vm0, %v5155_v6 }
  0x27   :  { %4266 = vmatmul.mubr.msk.f32.gmra.mrb[8].mxu0 %vm50_vm4, %v31_v21 }
  0x28   :  { %4268 = vmatprep.mubr.msk.f32.mxu0 %vm5154_vm0, %v5155_v6 }
  0x2b   :  { %4269 = vmatmul.mubr.msk.f32.gmra.mrb[10].mxu0 %vm50_vm4, %v32_v22 }
  0x2c   :  { %4271 = vmatprep.mubr.msk.f32.mxu0 %vm5154_vm0, %v5155_v6 }
  0x2f   :  { %4272 = vmatmul.mubr.msk.f32.gmra.mrb[12].mxu0 %vm50_vm4, %v33_v23 }
  0x30   :  { %4274 = vmatprep.mubr.msk.f32.mxu0 %vm5154_vm0, %v5155_v6 }
  0x33   :  { %4275 = vmatmul.mubr.msk.f32.gmra.mrb[14].mxu0 %vm50_vm4, %v34_v24 }
  0x34   :  { %4277 = vmatprep.mubr.msk.f32.mxu0 %vm5154_vm0, %v5155_v6 }
  0x37   :  { %4278 = vmatmul.mubr.msk.f32.gmra.mrb[16].mxu0 %vm50_vm4, %v35_v25 }
  0x38   :  { %4280 = vmatprep.mubr.msk.f32.mxu0 %vm5154_vm0, %v5155_v6 }
  0x3b   :  { %4281 = vmatmul.mubr.msk.f32.gmra.mrb[18].mxu0 %vm50_vm4, %v36_v26 }
  0x3c   :  { %4283 = vmatprep.mubr.msk.f32.mxu0 %vm5154_vm0, %v5155_v6 }
  0x3f   :  { %4284 = vmatmul.mubr.msk.f32.gmra.mrb[20].mxu0 %vm50_vm4, %v37_v27 }
  0x40   :  { %4286 = vmatprep.mubr.msk.f32.mxu0 %vm5154_vm0, %v5155_v6 }
  0x43   :  { %4287 = vmatmul.mubr.msk.f32.gmra.mrb[22].mxu0 %vm50_vm4, %v38_v28 }
  0x44   :  { %4289 = vmatprep.mubr.msk.f32.mxu0 %vm5154_vm0, %v5155_v6 }
  0x47   :  { %4290 = vmatmul.mubr.msk.f32.gmra.mrb[24].mxu0 %vm50_vm4, %v39_v29 }
  0x48   :  { %4398 = vmatprep.mubr.msk.f32.mxu0 %vm388_vm6, %v3809_v15 }
  0xea   :  { %v5311_v30 = vpop.f32.mrb[0].mxu0 }
  0xeb   :  { %v4255_v31 = vpop.f32.mrb[1].mxu0  ;;  %v227_v33 = vsel %vm226_vm5, %v5311_v30, 0.0 }
  0xee   :  { %v5313_v32 = vpop.f32.mrb[2].mxu0 }
  0xef   :  { %v228_v34 = vsel %vm226_vm5, %v5313_v32, 0.0  ;;  %v4258_v35 = vpop.f32.mrb[3].mxu0 }
  0xf0   :  { %v229_v36 = vadd.f32 %v228_v34, %v227_v33 }
  0xf2   :  { %v5319_v37 = vpop.f32.mrb[4].mxu0 }
  0xf3   :  { %v230_v38 = vsel %vm226_vm5, %v5319_v37, 0.0  ;;  %v4261_v39 = vpop.f32.mrb[5].mxu0 }
  0xf4   :  { %v231_v40 = vadd.f32 %v230_v38, %v229_v36 }
  0xf6   :  { %v5323_v41 = vpop.f32.mrb[6].mxu0 }
  0xf7   :  { %v232_v42 = vsel %vm226_vm5, %v5323_v41, 0.0  ;;  %v4264_v43 = vpop.f32.mrb[7].mxu0 }
  0xf8   :  { %v233_v44 = vadd.f32 %v232_v42, %v231_v40 }
  0xfa   :  { %v5327_v45 = vpop.f32.mrb[8].mxu0 }
  0xfb   :  { %v234_v46 = vsel %vm226_vm5, %v5327_v45, 0.0  ;;  %v4267_v47 = vpop.f32.mrb[9].mxu0 }
  0xfc   :  { %v235_v48 = vadd.f32 %v234_v46, %v233_v44 }
  0xfe   :  { %v5331_v49 = vpop.f32.mrb[10].mxu0 }
  0xff   :  { %v236_v50 = vsel %vm226_vm5, %v5331_v49, 0.0  ;;  %v4270_v51 = vpop.f32.mrb[11].mxu0 }
 0x100   :  { %v237_v52 = vadd.f32 %v236_v50, %v235_v48 }
 0x102   :  { %v5335_v53 = vpop.f32.mrb[12].mxu0 }
 0x103   :  { %v238_v54 = vsel %vm226_vm5, %v5335_v53, 0.0  ;;  %v4273_v55 = vpop.f32.mrb[13].mxu0 }
 0x104   :  { %v239_v56 = vadd.f32 %v238_v54, %v237_v52 }
 0x106   :  { %v5339_v57 = vpop.f32.mrb[14].mxu0 }
 0x107   :  { %v240_v58 = vsel %vm226_vm5, %v5339_v57, 0.0  ;;  %v4276_v59 = vpop.f32.mrb[15].mxu0 }
 0x108   :  { %v241_v60 = vadd.f32 %v240_v58, %v239_v56 }
 0x10a   :  { %v5343_v61 = vpop.f32.mrb[16].mxu0 }
 0x10b   :  { %v242_v62 = vsel %vm226_vm5, %v5343_v61, 0.0  ;;  %v4279_v63 = vpop.f32.mrb[17].mxu0 }
 0x10c   :  { %v243_v0 = vadd.f32 %v242_v62, %v241_v60 }
 0x10e   :  { %v5347_v1 = vpop.f32.mrb[18].mxu0 }
 0x10f   :  { %v244_v2 = vsel %vm226_vm5, %v5347_v1, 0.0  ;;  %v4282_v4 = vpop.f32.mrb[19].mxu0 }
 0x110   :  { %v245_v5 = vadd.f32 %v244_v2, %v243_v0 }
 0x112   :  { %v5351_v7 = vpop.f32.mrb[20].mxu0 }
 0x113   :  { %v246_v8 = vsel %vm226_vm5, %v5351_v7, 0.0  ;;  %v4285_v9 = vpop.f32.mrb[21].mxu0 }
 0x114   :  { %v247_v10 = vadd.f32 %v246_v8, %v245_v5 }
 0x116   :  { %v5355_v11 = vpop.f32.mrb[22].mxu0 }
 0x117   :  { %v248_v13 = vsel %vm226_vm5, %v5355_v11, 0.0  ;;  %v4288_v14 = vpop.f32.mrb[23].mxu0 }
 0x118   :  { %v249_v16 = vadd.f32 %v248_v13, %v247_v10 }
 0x11a   :  { %v5367_v17 = vpop.f32.mrb[24].mxu0 }
 0x11b   :  { %v251_v18 = vsel %vm250_vm7, %v5367_v17, 0.0  ;;  %v4291_v19 = vpop.f32.mrb[25].mxu0 }
 0x11c   :  { %v252_v20 = vadd.f32 %v251_v18, %v249_v16 }
 0x11e   :  { %v253_v21 = vrot.slane %v252_v20, 4 }
 0x120   :  { %v254_v22 = vadd.f32 %v253_v21, %v252_v20 }
 0x122   :  { %v255_v23 = vrot.slane %v254_v22, 2 }
 0x124   :  { %v256_v24 = vadd.f32 %v255_v23, %v254_v22 }
 0x126   :  { %v257_v25 = vrot.slane %v256_v24, 1 }
 0x128   :  { %v258_v26 = vadd.f32 %v257_v25, %v256_v24 }
 0x12a   :  { %v5371_v27 = vmul.f32 0.010204081, %v258_v26 }
 0x12c   :  { %v261_v28 = vsub.f32 %v5311_v30, %v5371_v27  ;;  %v262_v29 = vsub.f32 %v5313_v32, %v5371_v27  ;;  %v263_v31 = vsub.f32 %v5319_v37, %v5371_v27  ;;  %v264_v33 = vsub.f32 %v5323_v41, %v5371_v27 }
 0x12d   :  { %v265_v34 = vsub.f32 %v5327_v45, %v5371_v27  ;;  %v266_v35 = vsub.f32 %v5331_v49, %v5371_v27  ;;  %v267_v36 = vsub.f32 %v5335_v53, %v5371_v27  ;;  %v268_v38 = vsub.f32 %v5339_v57, %v5371_v27 }
 0x12e   :  { %v269_v39 = vsub.f32 %v5343_v61, %v5371_v27  ;;  %v270_v40 = vsub.f32 %v5347_v1, %v5371_v27  ;;  %v271_v42 = vsub.f32 %v5351_v7, %v5371_v27  ;;  %v272_v43 = vsub.f32 %v5355_v11, %v5371_v27 }
 0x12f   :  { %v273_v44 = vsub.f32 %v5367_v17, %v5371_v27  ;;  %v274_v46 = vmul.f32 %v261_v28, %v261_v28  ;;  %v275_v47 = vmul.f32 %v262_v29, %v262_v29  ;;  %v276_v48 = vmul.f32 %v263_v31, %v263_v31 }
 0x130   :  { %v277_v50 = vmul.f32 %v264_v33, %v264_v33  ;;  %v278_v55 = vmul.f32 %v265_v34, %v265_v34  ;;  %v279_v59 = vmul.f32 %v266_v35, %v266_v35  ;;  %v280_v63 = vmul.f32 %v267_v36, %v267_v36 }
 0x131   :  { %v287_v51 = vsel %vm226_vm5, %v274_v46, 0.0  ;;  %v288_v52 = vsel %vm226_vm5, %v275_v47, 0.0  ;;  %v290_v56 = vsel %vm226_vm5, %v276_v48, 0.0  ;;  %v281_v4 = vmul.f32 %v268_v38, %v268_v38  ;;  %v224_v46 = vld [vmem:[%s6021_s6] sm:$0x1] }
 0x132   :  { %v289_v54 = vadd.f32 %v288_v52, %v287_v51  ;;  %v292_v60 = vsel %vm226_vm5, %v277_v50, 0.0  ;;  %v294_v0 = vsel %vm226_vm5, %v278_v55, 0.0  ;;  %v296_v5 = vsel %vm226_vm5, %v279_v59, 0.0 }
 0x133   :  { %v282_v9 = vmul.f32 %v269_v39, %v269_v39  ;;  %v298_v10 = vsel %vm226_vm5, %v280_v63, 0.0  ;;  %v283_v13 = vmul.f32 %v270_v40, %v270_v40  ;;  %v300_v14 = vsel %vm226_vm5, %v281_v4, 0.0 }
 0x134   :  { %v291_v58 = vadd.f32 %v290_v56, %v289_v54  ;;  %v284_v16 = vmul.f32 %v271_v42, %v271_v42  ;;  %v285_v20 = vmul.f32 %v272_v43, %v272_v43  ;;  %v286_v23 = vmul.f32 %v273_v44, %v273_v44  ;;  %v225_v54 = vld [vmem:[%s6021_s6 + $0x1] sm:$0x1] }
 0x135   :  { %v302_v18 = vsel %vm226_vm5, %v282_v9, 0.0  ;;  %v304_v21 = vsel %vm226_vm5, %v283_v13, 0.0  ;;  %v322_v43 = vlaneseq }
 0x136   :  { %v293_v62 = vadd.f32 %v292_v60, %v291_v58  ;;  %v306_v24 = vsel %vm226_vm5, %v284_v16, 0.0  ;;  %v308_v26 = vsel %vm226_vm5, %v285_v20, 0.0  ;;  %v310_v29 = vsel %vm250_vm7, %v286_v23, 0.0 }
 0x137   :  { %v323_v44 = vshrl.u32 %v322_v43, 7 }
 0x138   :  { %v295_v2 = vadd.f32 %v294_v0, %v293_v62 }
 0x139   :  { %v5415_v47 = vsub.s32 0, %v323_v44 }
 0x13a   :  { %v297_v8 = vadd.f32 %v296_v5, %v295_v2 }
 0x13c   :  { %v299_v12 = vadd.f32 %v298_v10, %v297_v8 }
 0x13e   :  { %v301_v15 = vadd.f32 %v300_v14, %v299_v12 }
 0x140   :  { %v303_v19 = vadd.f32 %v302_v18, %v301_v15 }
 0x142   :  { %v305_v22 = vadd.f32 %v304_v21, %v303_v19 }
 0x144   :  { %v307_v25 = vadd.f32 %v306_v24, %v305_v22 }
 0x146   :  { %v309_v28 = vadd.f32 %v308_v26, %v307_v25 }
 0x148   :  { %v311_v31 = vadd.f32 %v310_v29, %v309_v28 }
 0x14a   :  { %v312_v33 = vrot.slane %v311_v31, 4 }
 0x14c   :  { %v313_v34 = vadd.f32 %v312_v33, %v311_v31 }
 0x14e   :  { %v314_v35 = vrot.slane %v313_v34, 2 }
 0x150   :  { %v315_v36 = vadd.f32 %v314_v35, %v313_v34 }
 0x152   :  { %v316_v38 = vrot.slane %v315_v36, 1 }
 0x154   :  { %v317_v39 = vadd.f32 %v316_v38, %v315_v36 }
 0x156   :  { %v318_v40 = vmul.f32 0.010204081, %v317_v39 }
 0x158   :  { %v319_v42 = vadd.f32 1e-05, %v318_v40 }
 0x15a   :  { %5119 = vrsqrt.f32 %v319_v42 }
 0x164   :  { %v5120_v48 = vpop.eup %5119 }
 0x165   :  { %v321_v50 = vmul.f32 %v5120_v48, %v224_v46 }
 0x167   :  { %v325_v51 = vrot.slane %v321_v50, %v5415_v47  ;;  %v339_v52 = vmul.f32 %v321_v50, %v5371_v27 }
 0x169   :  { %v326_v55 = vmul.f32 %v325_v51, %v5311_v30  ;;  %v327_v56 = vmul.f32 %v325_v51, %v5313_v32  ;;  %v328_v58 = vmul.f32 %v325_v51, %v5319_v37  ;;  %v329_v59 = vmul.f32 %v325_v51, %v5323_v41 }
 0x16a   :  { %v330_v60 = vmul.f32 %v325_v51, %v5327_v45  ;;  %v331_v62 = vmul.f32 %v325_v51, %v5331_v49  ;;  %v332_v63 = vmul.f32 %v325_v51, %v5335_v53  ;;  %v333_v27 = vmul.f32 %v325_v51, %v5339_v57 }
 0x16b   :  { %v334_v0 = vmul.f32 %v325_v51, %v5343_v61  ;;  %v335_v2 = vmul.f32 %v325_v51, %v5347_v1  ;;  %v336_v30 = vmul.f32 %v325_v51, %v5351_v7  ;;  %v337_v32 = vmul.f32 %v325_v51, %v5355_v11 }
 0x16c   :  { %v338_v37 = vmul.f32 %v325_v51, %v5367_v17  ;;  %v340_v4 = vsub.f32 %v225_v54, %v339_v52  ;;  %v385_v54 = vld [vmem:[%s6017_s2 + $0x8] sm:$0xff] }
 0x16e   :  { %v344_v41 = vrot.slane %v340_v4, %v5415_v47  ;;  %v3854_v4 = vld [vmem:[%s6017_s2 + $0xa0] sm:$0xff] }
 0x170   :  { %v345_v45 = vadd.f32 %v344_v41, %v326_v55  ;;  %v346_v5 = vadd.f32 %v344_v41, %v327_v56  ;;  %v347_v49 = vadd.f32 %v344_v41, %v328_v58  ;;  %v348_v8 = vadd.f32 %v344_v41, %v329_v59  ;;  %v3810_v55 = vld [vmem:[%s6017_s2 + $0x48] sm:$0xff]  ;;  %v386_v56 = vld [vmem:[%s6017_s2 + $0x10] sm:$0xff]  ;;  %v387_v59 = vld [vmem:[%s6017_s2 + $0x18] sm:$0xff] }
 0x171   :  { %v349_v53 = vadd.f32 %v344_v41, %v330_v60  ;;  %v350_v9 = vadd.f32 %v344_v41, %v331_v62  ;;  %v351_v57 = vadd.f32 %v344_v41, %v332_v63  ;;  %v352_v10 = vadd.f32 %v344_v41, %v333_v27  ;;  %v3811_v58 = vld [vmem:[%s6017_s2 + $0x50] sm:$0xff]  ;;  %v3812_v60 = vld [vmem:[%s6017_s2 + $0x58] sm:$0xff]  ;;  %v3789_v62 = vld [vmem:[%s6017_s2 + $0x20] sm:$0xff] }
 0x172   :  { %v353_v61 = vadd.f32 %v344_v41, %v334_v0  ;;  %v354_v12 = vadd.f32 %v344_v41, %v335_v2  ;;  %v355_v1 = vadd.f32 %v344_v41, %v336_v30  ;;  %v356_v13 = vadd.f32 %v344_v41, %v337_v32  ;;  %v3824_v63 = vld [vmem:[%s6017_s2 + $0x60] sm:$0xff]  ;;  %v3790_v27 = vld [vmem:[%s6017_s2 + $0x28] sm:$0xff]  ;;  %v3791_v2 = vld [vmem:[%s6017_s2 + $0x30] sm:$0xff] }
 0x173   :  { %v357_v7 = vadd.f32 %v344_v41, %v338_v37  ;;  %v358_v14 = vmul.f32 0.01, %v345_v45  ;;  %v359_v11 = vmul.f32 0.01, %v346_v5  ;;  %v360_v15 = vmul.f32 0.01, %v347_v49 }
 0x174   :  { %v361_v17 = vmul.f32 0.01, %v348_v8  ;;  %v362_v16 = vmul.f32 0.01, %v349_v53  ;;  %v363_v18 = vmul.f32 0.01, %v350_v9 }
 0x175   :  { %v364_v19 = vmul.f32 0.01, %v351_v57  ;;  %v365_v20 = vmul.f32 0.01, %v352_v10  ;;  %v366_v21 = vmul.f32 0.01, %v353_v61  ;;  %v371_v22 = vmax.f32 %v345_v45, %v358_v14 }
 0x176   :  { %v367_v23 = vmul.f32 0.01, %v354_v12  ;;  %v368_v24 = vmul.f32 0.01, %v355_v1  ;;  %v369_v25 = vmul.f32 0.01, %v356_v13  ;;  %v372_v26 = vmax.f32 %v346_v5, %v359_v11 }
 0x177   :  { %v373_v28 = vmax.f32 %v347_v49, %v360_v15  ;;  %v374_v29 = vmax.f32 %v348_v8, %v361_v17  ;;  %v375_v31 = vmax.f32 %v349_v53, %v362_v16  ;;  %v376_v33 = vmax.f32 %v350_v9, %v363_v18  ;;  %v3825_v0 = vld [vmem:[%s6017_s2 + $0x68] sm:$0xff]  ;;  %v3826_v30 = vld [vmem:[%s6017_s2 + $0x70] sm:$0xff]  ;;  %v3792_v32 = vld [vmem:[%s6017_s2 + $0x38] sm:$0xff] }
 0x178   :  { %v377_v34 = vmax.f32 %v351_v57, %v364_v19  ;;  %v378_v35 = vmax.f32 %v352_v10, %v365_v20  ;;  %v379_v36 = vmax.f32 %v353_v61, %v366_v21  ;;  %v380_v38 = vmax.f32 %v354_v12, %v367_v23  ;;  %v3827_v37 = vld [vmem:[%s6017_s2 + $0x78] sm:$0xff]  ;;  %v3855_v41 = vld [vmem:[%s6017_s2 + $0xa8] sm:$0xff]  ;;  %v3856_v45 = vld [vmem:[%s6017_s2 + $0xb0] sm:$0xff] }
 0x179   :  { %v381_v39 = vmax.f32 %v355_v1, %v368_v24  ;;  %v382_v40 = vmax.f32 %v356_v13, %v369_v25  ;;  %v5436_v42 = vpack.c.bf16 %v372_v26, %v371_v22  ;;  %v5438_v43 = vpack.c.bf16 %v374_v29, %v373_v28  ;;  %v3857_v5 = vld [vmem:[%s6017_s2 + $0xb8] sm:$0xff]  ;;  %v3869_v49 = vld [vmem:[%s6017_s2 + $0xc0] sm:$0xff]  ;;  %v3870_v8 = vld [vmem:[%s6017_s2 + $0xc8] sm:$0xff] }
 0x17a   :  { %v5440_v44 = vpack.c.bf16 %v376_v33, %v375_v31  ;;  %v5442_v46 = vpack.c.bf16 %v378_v35, %v377_v34  ;;  %v5444_v48 = vpack.c.bf16 %v380_v38, %v379_v36  ;;  %v370_v51 = vmul.f32 0.01, %v357_v7  ;;  %v3798_v53 = vld [vmem:[%s6018_s3 + $0x8] sm:$0x1f]  ;;  %v490_v9 = vld [vmem:[%s6018_s3] sm:$0x1f] }
 0x17b   :  { %v5446_v50 = vpack.c.bf16 %v382_v40, %v381_v39  ;;  %4813 = vmatprep.subr.bf16.mxu1 %v5436_v42  ;;  %4861 = vmatprep.subr.bf16.mxu0 %v5436_v42  ;;  %v3871_v57 = vld [vmem:[%s6017_s2 + $0xd0] sm:$0xff]  ;;  %v3872_v10 = vld [vmem:[%s6017_s2 + $0xd8] sm:$0xff]  ;;  %v3839_v29 = vld [vmem:[%s6017_s2 + $0x80] sm:$0xff] }
 0x17c   :  { %4815 = vmatpush3.bf16.msra.mxu1 %v5436_v42  ;;  %4863 = vmatpush3.bf16.msra.mxu0 %v5436_v42  ;;  %v5470_v52 = vmax.f32 %v357_v7, %v370_v51  ;;  %v3818_v19 = vld [vmem:[%s6018_s3 + $0x10] sm:$0x1f]  ;;  %v3833_v25 = vld [vmem:[%s6018_s3 + $0x18] sm:$0x1f]  ;;  %v3840_v31 = vld [vmem:[%s6017_s2 + $0x88] sm:$0xff] }
 0x17d   :  { %4817 = vmatprep.subr.bf16.mxu1 %v5438_v43  ;;  %4865 = vmatprep.subr.bf16.mxu0 %v5438_v43  ;;  %v3848_v33 = vld [vmem:[%s6018_s3 + $0x20] sm:$0x1f]  ;;  %v3841_v34 = vld [vmem:[%s6017_s2 + $0x90] sm:$0xff]  ;;  %v3842_v35 = vld [vmem:[%s6017_s2 + $0x98] sm:$0xff] }
 0x17e   :  { %v3863_v36 = vld [vmem:[%s6018_s3 + $0x28] sm:$0x1f] }
 0x180   :  { %4819 = vmatpush3.bf16.msra.mxu1 %v5438_v43  ;;  %4867 = vmatpush3.bf16.msra.mxu0 %v5438_v43 }
 0x181   :  { %4821 = vmatprep.subr.bf16.mxu1 %v5440_v44  ;;  %4869 = vmatprep.subr.bf16.mxu0 %v5440_v44 }
 0x184   :  { %4823 = vmatpush3.bf16.msra.mxu1 %v5440_v44  ;;  %4871 = vmatpush3.bf16.msra.mxu0 %v5440_v44 }
 0x185   :  { %4825 = vmatprep.subr.bf16.mxu1 %v5442_v46  ;;  %4873 = vmatprep.subr.bf16.mxu0 %v5442_v46 }
 0x188   :  { %4827 = vmatpush3.bf16.msra.mxu1 %v5442_v46  ;;  %4875 = vmatpush3.bf16.msra.mxu0 %v5442_v46 }
 0x189   :  { %4829 = vmatprep.subr.bf16.mxu1 %v5444_v48  ;;  %4877 = vmatprep.subr.bf16.mxu0 %v5444_v48 }
 0x18c   :  { %4831 = vmatpush3.bf16.msra.mxu1 %v5444_v48  ;;  %4879 = vmatpush3.bf16.msra.mxu0 %v5444_v48 }
 0x18d   :  { %4833 = vmatprep.subr.bf16.mxu1 %v5446_v50  ;;  %4881 = vmatprep.subr.bf16.mxu0 %v5446_v50 }
 0x190   :  { %4835 = vmatpush3.bf16.msra.mxu1 %v5446_v50  ;;  %4883 = vmatpush3.bf16.msra.mxu0 %v5446_v50 }
 0x191   :  { %4316 = vmatprep.subr.msk.mxu1 %vm401_vm8, %v5470_v52  ;;  %4396 = vmatprep.subr.msk.mxu0 %vm401_vm8, %v5470_v52 }
 0x194   :  { %4317 = vmatpush3.msk.msra.mxu1 %vm401_vm8, %v5470_v52  ;;  %4397 = vmatpush3.msk.msra.mxu0 %vm401_vm8, %v5470_v52 }
 0x195   :  { %4837 = vmatprep.subr.bf16.mxu1 %v5436_v42  ;;  %4885 = vmatprep.subr.bf16.mxu0 %v5436_v42 }
 0x196   :  { %4319 = vmatmul.mubr.msk.f32.vlgmr.msra.gmra.mrb[0].mxu1 %vm388_vm6, %v385_v54  ;;  %4399 = vmatmul.mubr.msk.f32.vlgmr.msra.gmra.mrb[26].mxu0 %vm388_vm6, %v3810_v55 }
 0x197   :  { %4839 = vmatpush3.bf16.msra.mxu1 %v5436_v42  ;;  %4887 = vmatpush3.bf16.msra.mxu0 %v5436_v42 }
 0x198   :  { %4841 = vmatprep.subr.bf16.mxu1 %v5438_v43  ;;  %4889 = vmatprep.subr.bf16.mxu0 %v5438_v43 }
 0x199   :  { %4321 = vmatprep.mubr.msk.f32.mxu1 %vm388_vm6, %v386_v56  ;;  %4401 = vmatprep.mubr.msk.f32.mxu0 %vm388_vm6, %v3811_v58  ;;  %v3899_v56 = vld [vmem:[%s6017_s2 + $0x100] sm:$0xff]  ;;  %v3900_v58 = vld [vmem:[%s6017_s2 + $0x108] sm:$0xff] }
 0x19a   :  { %4322 = vmatmul.mubr.msk.f32.gmra.mrb[2].mxu1 %vm388_vm6, %v387_v59  ;;  %4402 = vmatmul.mubr.msk.f32.gmra.mrb[28].mxu0 %vm388_vm6, %v3812_v60  ;;  %v3901_v59 = vld [vmem:[%s6017_s2 + $0x110] sm:$0xff]  ;;  %v3902_v60 = vld [vmem:[%s6017_s2 + $0x118] sm:$0xff] }
 0x19b   :  { %4843 = vmatpush3.bf16.msra.mxu1 %v5438_v43  ;;  %4891 = vmatpush3.bf16.msra.mxu0 %v5438_v43 }
 0x19c   :  { %4845 = vmatprep.subr.bf16.mxu1 %v5440_v44  ;;  %4893 = vmatprep.subr.bf16.mxu0 %v5440_v44 }
 0x19d   :  { %4350 = vmatprep.mubr.msk.f32.mxu1 %vm388_vm6, %v3789_v62  ;;  %4438 = vmatprep.mubr.msk.f32.mxu0 %vm388_vm6, %v3824_v63 }
 0x19f   :  { %4847 = vmatpush3.bf16.msra.mxu1 %v5440_v44  ;;  %4895 = vmatpush3.bf16.msra.mxu0 %v5440_v44 }
 0x1a0   :  { %4849 = vmatprep.subr.bf16.mxu1 %v5442_v46  ;;  %4897 = vmatprep.subr.bf16.mxu0 %v5442_v46 }
 0x1a3   :  { %4851 = vmatpush3.bf16.msra.mxu1 %v5442_v46  ;;  %4899 = vmatpush3.bf16.msra.mxu0 %v5442_v46 }
 0x1a4   :  { %4853 = vmatprep.subr.bf16.mxu1 %v5444_v48  ;;  %4901 = vmatprep.subr.bf16.mxu0 %v5444_v48 }
 0x1a7   :  { %4855 = vmatpush3.bf16.msra.mxu1 %v5444_v48  ;;  %4903 = vmatpush3.bf16.msra.mxu0 %v5444_v48 }
 0x1a8   :  { %4857 = vmatprep.subr.bf16.mxu1 %v5446_v50  ;;  %4905 = vmatprep.subr.bf16.mxu0 %v5446_v50 }
 0x1ab   :  { %4859 = vmatpush3.bf16.msra.mxu1 %v5446_v50  ;;  %4907 = vmatpush3.bf16.msra.mxu0 %v5446_v50 }
 0x1ac   :  { %4348 = vmatprep.subr.msk.mxu1 %vm401_vm8, %v5470_v52  ;;  %4436 = vmatprep.subr.msk.mxu0 %vm401_vm8, %v5470_v52 }
 0x1af   :  { %4349 = vmatpush3.msk.msra.mxu1 %vm401_vm8, %v5470_v52  ;;  %4437 = vmatpush3.msk.msra.mxu0 %vm401_vm8, %v5470_v52 }
 0x1b0   :  { %4351 = vmatmul.mubr.msk.f32.vlgmr.msra.gmra.mrb[4].mxu1 %vm388_vm6, %v3790_v27  ;;  %4933 = vmatprep.subr.bf16.mxu0 %v5436_v42  ;;  %v3878_v27 = vld [vmem:[%s6018_s3 + $0x30] sm:$0x1f] }
 0x1b1   :  { %4439 = vmatmul.mubr.msk.f32.vlgmr.msra.gmra.mrb[30].mxu0 %vm388_vm6, %v3825_v0  ;;  %4353 = vmatprep.mubr.msk.f32.mxu1 %vm388_vm6, %v3791_v2 }
 0x1b2   :  { %4935 = vmatpush3.bf16.msra.mxu0 %v5436_v42  ;;  %4441 = vmatprep.mubr.msk.f32.mxu0 %vm388_vm6, %v3826_v30  ;;  %v3884_v30 = vld [vmem:[%s6017_s2 + $0xe0] sm:$0xff] }
 0x1b3   :  { %4937 = vmatprep.subr.bf16.mxu0 %v5438_v43  ;;  %4356 = vmatprep.subr.msk.mxu1 %vm607_vm9, %v3798_v53 }
 0x1b4   :  { %4354 = vmatmul.mubr.msk.f32.gmra.mrb[6].mxu1 %vm388_vm6, %v3792_v32 }
 0x1b5   :  { %4442 = vmatmul.mubr.msk.f32.gmra.mrb[32].mxu0 %vm388_vm6, %v3827_v37  ;;  %4357 = vmatpush3.msk.msra.mxu1 %vm607_vm9, %v3798_v53 }
 0x1b6   :  { %4939 = vmatpush3.bf16.msra.mxu0 %v5438_v43  ;;  %4518 = vmatprep.mubr.msk.f32.mxu0 %vm388_vm6, %v3854_v4 }
 0x1b7   :  { %4941 = vmatprep.subr.bf16.mxu0 %v5440_v44  ;;  %4364 = vmatprep.subr.msk.mxu1 %vm607_vm9, %v490_v9 }
 0x1ba   :  { %4943 = vmatpush3.bf16.msra.mxu0 %v5440_v44 }
 0x1bb   :  { %4945 = vmatprep.subr.bf16.mxu0 %v5442_v46 }
 0x1be   :  { %4947 = vmatpush3.bf16.msra.mxu0 %v5442_v46 }
 0x1bf   :  { %4949 = vmatprep.subr.bf16.mxu0 %v5444_v48 }
 0x1c2   :  { %4951 = vmatpush3.bf16.msra.mxu0 %v5444_v48 }
 0x1c3   :  { %4953 = vmatprep.subr.bf16.mxu0 %v5446_v50 }
 0x1c6   :  { %4955 = vmatpush3.bf16.msra.mxu0 %v5446_v50 }
 0x1c7   :  { %4516 = vmatprep.subr.msk.mxu0 %vm401_vm8, %v5470_v52 }
 0x1ca   :  { %4517 = vmatpush3.msk.msra.mxu0 %vm401_vm8, %v5470_v52 }
 0x1cb   :  { %4957 = vmatprep.subr.bf16.mxu0 %v5436_v42  ;;  %4519 = vmatmul.mubr.msk.f32.vlgmr.msra.gmra.mrb[34].mxu0 %vm388_vm6, %v3855_v41 }
 0x1cc   :  { %4959 = vmatpush3.bf16.msra.mxu0 %v5436_v42  ;;  %4521 = vmatprep.mubr.msk.f32.mxu0 %vm388_vm6, %v3856_v45 }
 0x1cd   :  { %4961 = vmatprep.subr.bf16.mxu0 %v5438_v43 }
 0x1cf   :  { %4522 = vmatmul.mubr.msk.f32.gmra.mrb[36].mxu0 %vm388_vm6, %v3857_v5 }
 0x1d0   :  { %4963 = vmatpush3.bf16.msra.mxu0 %v5438_v43  ;;  %4558 = vmatprep.mubr.msk.f32.mxu0 %vm388_vm6, %v3869_v49 }
 0x1d1   :  { %4965 = vmatprep.subr.bf16.mxu0 %v5440_v44 }
 0x1d4   :  { %4967 = vmatpush3.bf16.msra.mxu0 %v5440_v44 }
 0x1d5   :  { %4969 = vmatprep.subr.bf16.mxu0 %v5442_v46 }
 0x1d8   :  { %4971 = vmatpush3.bf16.msra.mxu0 %v5442_v46 }
 0x1d9   :  { %4973 = vmatprep.subr.bf16.mxu0 %v5444_v48 }
 0x1dc   :  { %4975 = vmatpush3.bf16.msra.mxu0 %v5444_v48 }
 0x1dd   :  { %4977 = vmatprep.subr.bf16.mxu0 %v5446_v50 }
 0x1e0   :  { %4979 = vmatpush3.bf16.msra.mxu0 %v5446_v50 }
 0x1e1   :  { %4556 = vmatprep.subr.msk.mxu0 %vm401_vm8, %v5470_v52 }
 0x1e4   :  { %4557 = vmatpush3.msk.msra.mxu0 %vm401_vm8, %v5470_v52 }
 0x1e5   :  { %5005 = vmatprep.subr.bf16.mxu0 %v5436_v42  ;;  %4559 = vmatmul.mubr.msk.f32.vlgmr.msra.gmra.mrb[38].mxu0 %vm388_vm6, %v3870_v8 }
 0x1e6   :  { %5007 = vmatpush3.bf16.msra.mxu0 %v5436_v42  ;;  %4561 = vmatprep.mubr.msk.f32.mxu0 %vm388_vm6, %v3871_v57 }
 0x1e7   :  { %5009 = vmatprep.subr.bf16.mxu0 %v5438_v43 }
 0x1e9   :  { %4562 = vmatmul.mubr.msk.f32.gmra.mrb[40].mxu0 %vm388_vm6, %v3872_v10 }
 0x1ea   :  { %5011 = vmatpush3.bf16.msra.mxu0 %v5438_v43  ;;  %4638 = vmatprep.mubr.msk.f32.mxu0 %vm388_vm6, %v3899_v56 }
 0x1eb   :  { %5013 = vmatprep.subr.bf16.mxu0 %v5440_v44 }
 0x1ee   :  { %5015 = vmatpush3.bf16.msra.mxu0 %v5440_v44 }
 0x1ef   :  { %5017 = vmatprep.subr.bf16.mxu0 %v5442_v46 }
 0x1f2   :  { %5019 = vmatpush3.bf16.msra.mxu0 %v5442_v46 }
 0x1f3   :  { %5021 = vmatprep.subr.bf16.mxu0 %v5444_v48 }
 0x1f6   :  { %5023 = vmatpush3.bf16.msra.mxu0 %v5444_v48 }
 0x1f7   :  { %5025 = vmatprep.subr.bf16.mxu0 %v5446_v50 }
 0x1fa   :  { %5027 = vmatpush3.bf16.msra.mxu0 %v5446_v50 }
 0x1fb   :  { %4636 = vmatprep.subr.msk.mxu0 %vm401_vm8, %v5470_v52 }
 0x1fe   :  { %4637 = vmatpush3.msk.msra.mxu0 %vm401_vm8, %v5470_v52 }
 0x1ff   :  { %5028 = vmatprep.subr.bf16.mxu0 %v5153_v3  ;;  %4639 = vmatmul.mubr.msk.f32.vlgmr.msra.gmra.mrb[42].mxu0 %vm388_vm6, %v3900_v58 }
 0x200   :  { %4641 = vmatprep.mubr.msk.f32.mxu0 %vm388_vm6, %v3901_v59 }
 0x203   :  { %4642 = vmatmul.mubr.msk.f32.gmra.mrb[44].mxu0 %vm388_vm6, %v3902_v60  ;;  %v2252_v60 = vld [vmem:[%s6021_s6 + $0x2] sm:$0x1] }
 0x204   :  { %4660 = vmatprep.mubr.msk.f32.mxu0 %vm5154_vm0, %v5155_v6 }
 0x269   :  { %v4320_v61 = vpop.f32.mrb[0].mxu1  ;;  %v4400_v12 = vpop.f32.mrb[26].mxu0 }
 0x26a   :  { %v471_v1 = vpop.f32.mrb[1].mxu1  ;;  %v879_v13 = vpop.f32.mrb[27].mxu0 }
 0x26d   :  { %v4323_v7 = vpop.f32.mrb[2].mxu1  ;;  %v4403_v14 = vpop.f32.mrb[28].mxu0 }
 0x26e   :  { %v481_v11 = vpop.f32.mrb[3].mxu1  ;;  %v889_v15 = vpop.f32.mrb[29].mxu0 }
 0x283   :  { %v4352_v17 = vpop.f32.mrb[4].mxu1 }
 0x284   :  { %v574_v16 = vpop.f32.mrb[5].mxu1  ;;  %v4440_v18 = vpop.f32.mrb[30].mxu0 }
 0x285   :  { %4358 = vmatprep.mubr.msk.f32.mxu1 %vm226_vm5, %v574_v16  ;;  %v1087_v20 = vpop.f32.mrb[31].mxu0 }
 0x286   :  { %4359 = vmatmul.mubr.msk.f32.vlgmr.msra.gmra.mrb[8].mxu1 %vm226_vm5, %v4352_v17 }
 0x287   :  { %v4355_v21 = vpop.f32.mrb[6].mxu1  ;;  %4365 = vmatpush3.msk.msra.mxu1 %vm607_vm9, %v490_v9 }
 0x288   :  { %v584_v22 = vpop.f32.mrb[7].mxu1  ;;  %4404 = vmatprep.subr.msk.mxu1 %vm607_vm9, %v3818_v19  ;;  %v4443_v23 = vpop.f32.mrb[32].mxu0 }
 0x289   :  { %4361 = vmatprep.mubr.msk.f32.mxu1 %vm226_vm5, %v584_v22  ;;  %v1097_v24 = vpop.f32.mrb[33].mxu0 }
 0x28a   :  { %4362 = vmatmul.mubr.msk.f32.gmra.mrb[10].mxu1 %vm226_vm5, %v4355_v21 }
 0x28b   :  { %4366 = vmatprep.mubr.msk.f32.mxu1 %vm226_vm5, %v471_v1 }
 0x28e   :  { %4367 = vmatmul.mubr.msk.f32.vlgmr.msra.gmra.mrb[8].mxu1 %vm226_vm5, %v4320_v61 }
 0x28f   :  { %4369 = vmatprep.mubr.msk.f32.mxu1 %vm226_vm5, %v481_v11  ;;  %4405 = vmatpush3.msk.msra.mxu1 %vm607_vm9, %v3818_v19 }
 0x290   :  { %4444 = vmatprep.subr.msk.mxu1 %vm607_vm9, %v3833_v25 }
 0x292   :  { %4370 = vmatmul.mubr.msk.f32.gmra.mrb[10].mxu1 %vm226_vm5, %v4323_v7 }
 0x293   :  { %4406 = vmatprep.mubr.msk.f32.mxu1 %vm226_vm5, %v879_v13 }
 0x296   :  { %4407 = vmatmul.mubr.msk.f32.vlgmr.msra.gmra.mrb[8].mxu1 %vm226_vm5, %v4400_v12 }
 0x297   :  { %4445 = vmatpush3.msk.msra.mxu1 %vm607_vm9, %v3833_v25  ;;  %4409 = vmatprep.mubr.msk.f32.mxu1 %vm226_vm5, %v889_v15 }
 0x298   :  { %4909 = vmatprep.subr.bf16.mxu1 %v5436_v42 }
 0x29a   :  { %4410 = vmatmul.mubr.msk.f32.gmra.mrb[10].mxu1 %vm226_vm5, %v4403_v14 }
 0x29b   :  { %4446 = vmatprep.mubr.msk.f32.mxu1 %vm226_vm5, %v1087_v20 }
 0x29e   :  { %4447 = vmatmul.mubr.msk.f32.vlgmr.msra.gmra.mrb[8].mxu1 %vm226_vm5, %v4440_v18  ;;  %v4520_v26 = vpop.f32.mrb[34].mxu0 }
 0x29f   :  { %4911 = vmatpush3.bf16.msra.mxu1 %v5436_v42  ;;  %4449 = vmatprep.mubr.msk.f32.mxu1 %vm226_vm5, %v1097_v24  ;;  %v1503_v28 = vpop.f32.mrb[35].mxu0 }
 0x2a0   :  { %4913 = vmatprep.subr.bf16.mxu1 %v5438_v43 }
 0x2a2   :  { %4450 = vmatmul.mubr.msk.f32.gmra.mrb[10].mxu1 %vm226_vm5, %v4443_v23  ;;  %v4523_v38 = vpop.f32.mrb[36].mxu0 }
 0x2a3   :  { %4915 = vmatpush3.bf16.msra.mxu1 %v5438_v43  ;;  %4478 = vmatprep.mubr.msk.f32.mxu1 %vm388_vm6, %v3839_v29  ;;  %v1513_v39 = vpop.f32.mrb[37].mxu0 }
 0x2a4   :  { %4917 = vmatprep.subr.bf16.mxu1 %v5440_v44 }
 0x2a7   :  { %4919 = vmatpush3.bf16.msra.mxu1 %v5440_v44 }
 0x2a8   :  { %4921 = vmatprep.subr.bf16.mxu1 %v5442_v46 }
 0x2ab   :  { %4923 = vmatpush3.bf16.msra.mxu1 %v5442_v46 }
 0x2ac   :  { %4925 = vmatprep.subr.bf16.mxu1 %v5444_v48 }
 0x2af   :  { %4927 = vmatpush3.bf16.msra.mxu1 %v5444_v48 }
 0x2b0   :  { %4929 = vmatprep.subr.bf16.mxu1 %v5446_v50 }
 0x2b3   :  { %4931 = vmatpush3.bf16.msra.mxu1 %v5446_v50 }
 0x2b4   :  { %4476 = vmatprep.subr.msk.mxu1 %vm401_vm8, %v5470_v52 }
 0x2b7   :  { %4477 = vmatpush3.msk.msra.mxu1 %vm401_vm8, %v5470_v52 }
 0x2b8   :  { %4479 = vmatmul.mubr.msk.f32.vlgmr.msra.gmra.mrb[12].mxu1 %vm388_vm6, %v3840_v31  ;;  %4484 = vmatprep.subr.msk.mxu1 %vm607_vm9, %v3848_v33  ;;  %v4560_v40 = vpop.f32.mrb[38].mxu0 }
 0x2b9   :  { %4481 = vmatprep.mubr.msk.f32.mxu1 %vm388_vm6, %v3841_v34  ;;  %4485 = vmatpush3.msk.msra.mxu1 %vm607_vm9, %v3848_v33  ;;  %v1711_v51 = vpop.f32.mrb[39].mxu0 }
 0x2ba   :  { %4524 = vmatprep.subr.msk.mxu1 %vm607_vm9, %v3863_v36 }
 0x2bc   :  { %4482 = vmatmul.mubr.msk.f32.gmra.mrb[14].mxu1 %vm388_vm6, %v3842_v35  ;;  %v4563_v54 = vpop.f32.mrb[40].mxu0 }
 0x2bd   :  { %v1721_v55 = vpop.f32.mrb[41].mxu0 }
 0x38b   :  { %v4480_v62 = vpop.f32.mrb[12].mxu1 }
 0x38c   :  { %v1295_v63 = vpop.f32.mrb[13].mxu1 }
 0x38d   :  { %4486 = vmatprep.mubr.msk.f32.mxu1 %vm226_vm5, %v1295_v63 }
 0x38e   :  { %4487 = vmatmul.mubr.msk.f32.vlgmr.msra.gmra.mrb[8].mxu1 %vm226_vm5, %v4480_v62 }
 0x38f   :  { %v4483_v0 = vpop.f32.mrb[14].mxu1  ;;  %4525 = vmatpush3.msk.msra.mxu1 %vm607_vm9, %v3863_v36 }
 0x390   :  { %v1305_v2 = vpop.f32.mrb[15].mxu1  ;;  %4564 = vmatprep.subr.msk.mxu1 %vm607_vm9, %v3878_v27 }
 0x391   :  { %4489 = vmatprep.mubr.msk.f32.mxu1 %vm226_vm5, %v1305_v2 }
 0x392   :  { %4490 = vmatmul.mubr.msk.f32.gmra.mrb[10].mxu1 %vm226_vm5, %v4483_v0 }
 0x393   :  { %4526 = vmatprep.mubr.msk.f32.mxu1 %vm226_vm5, %v1503_v28 }
 0x396   :  { %4527 = vmatmul.mubr.msk.f32.vlgmr.msra.gmra.mrb[8].mxu1 %vm226_vm5, %v4520_v26 }
 0x397   :  { %4565 = vmatpush3.msk.msra.mxu1 %vm607_vm9, %v3878_v27  ;;  %4529 = vmatprep.mubr.msk.f32.mxu1 %vm226_vm5, %v1513_v39  ;;  %v2253_v27 = vld [vmem:[%s6021_s6 + $0x3] sm:$0x1] }
 0x398   :  { %4981 = vmatprep.subr.bf16.mxu1 %v5436_v42 }
 0x39a   :  { %4530 = vmatmul.mubr.msk.f32.gmra.mrb[10].mxu1 %vm226_vm5, %v4523_v38 }
 0x39b   :  { %4566 = vmatprep.mubr.msk.f32.mxu1 %vm226_vm5, %v1711_v51 }
 0x39e   :  { %4567 = vmatmul.mubr.msk.f32.vlgmr.msra.gmra.mrb[8].mxu1 %vm226_vm5, %v4560_v40 }
 0x39f   :  { %4983 = vmatpush3.bf16.msra.mxu1 %v5436_v42  ;;  %4569 = vmatprep.mubr.msk.f32.mxu1 %vm226_vm5, %v1721_v55  ;;  %v3885_v42 = vld [vmem:[%s6017_s2 + $0xe8] sm:$0xff] }
 0x3a0   :  { %4985 = vmatprep.subr.bf16.mxu1 %v5438_v43 }
 0x3a2   :  { %4570 = vmatmul.mubr.msk.f32.gmra.mrb[10].mxu1 %vm226_vm5, %v4563_v54 }
 0x3a3   :  { %4987 = vmatpush3.bf16.msra.mxu1 %v5438_v43  ;;  %4598 = vmatprep.mubr.msk.f32.mxu1 %vm388_vm6, %v3884_v30  ;;  %v3893_v43 = vld [vmem:[%s6018_s3 + $0x38] sm:$0x1f] }
 0x3a4   :  { %4989 = vmatprep.subr.bf16.mxu1 %v5440_v44 }
 0x3a7   :  { %4991 = vmatpush3.bf16.msra.mxu1 %v5440_v44  ;;  %v3886_v44 = vld [vmem:[%s6017_s2 + $0xf0] sm:$0xff] }
 0x3a8   :  { %4993 = vmatprep.subr.bf16.mxu1 %v5442_v46 }
 0x3ab   :  { %4995 = vmatpush3.bf16.msra.mxu1 %v5442_v46  ;;  %v3887_v46 = vld [vmem:[%s6017_s2 + $0xf8] sm:$0xff] }
 0x3ac   :  { %4997 = vmatprep.subr.bf16.mxu1 %v5444_v48 }
 0x3af   :  { %4999 = vmatpush3.bf16.msra.mxu1 %v5444_v48  ;;  %v3908_v48 = vld [vmem:[%s6018_s3 + $0x40] sm:$0x1f] }
 0x3b0   :  { %5001 = vmatprep.subr.bf16.mxu1 %v5446_v50 }
 0x3b3   :  { %5003 = vmatpush3.bf16.msra.mxu1 %v5446_v50  ;;  %v4640_v50 = vpop.f32.mrb[42].mxu0 }
 0x3b4   :  { %4596 = vmatprep.subr.msk.mxu1 %vm401_vm8, %v5470_v52 }
 0x3b7   :  { %4597 = vmatpush3.msk.msra.mxu1 %vm401_vm8, %v5470_v52  ;;  %v2127_v52 = vpop.f32.mrb[43].mxu0 }
 0x3b8   :  { %4599 = vmatmul.mubr.msk.f32.vlgmr.msra.gmra.mrb[16].mxu1 %vm388_vm6, %v3885_v42  ;;  %4604 = vmatprep.subr.msk.mxu1 %vm607_vm9, %v3893_v43  ;;  %v4643_v32 = vpop.f32.mrb[44].mxu0 }
 0x3b9   :  { %4601 = vmatprep.mubr.msk.f32.mxu1 %vm388_vm6, %v3886_v44  ;;  %4605 = vmatpush3.msk.msra.mxu1 %vm607_vm9, %v3893_v43  ;;  %v2137_v37 = vpop.f32.mrb[45].mxu0 }
 0x3ba   :  { %4644 = vmatprep.subr.msk.mxu1 %vm607_vm9, %v3908_v48 }
 0x3bc   :  { %4602 = vmatmul.mubr.msk.f32.gmra.mrb[18].mxu1 %vm388_vm6, %v3887_v46 }
 0x48b   :  { %v4600_v4 = vpop.f32.mrb[16].mxu1 }
 0x48c   :  { %v1919_v41 = vpop.f32.mrb[17].mxu1 }
 0x48d   :  { %4606 = vmatprep.mubr.msk.f32.mxu1 %vm226_vm5, %v1919_v41 }
 0x48e   :  { %4607 = vmatmul.mubr.msk.f32.vlgmr.msra.gmra.mrb[8].mxu1 %vm226_vm5, %v4600_v4 }
 0x48f   :  { %v4603_v45 = vpop.f32.mrb[18].mxu1  ;;  %4645 = vmatpush3.msk.msra.mxu1 %vm607_vm9, %v3908_v48 }
 0x490   :  { %v1929_v5 = vpop.f32.mrb[19].mxu1  ;;  %5034 = vmatprep.subr.bf16.mxu1 %v5153_v3 }
 0x491   :  { %4609 = vmatprep.mubr.msk.f32.mxu1 %vm226_vm5, %v1929_v5 }
 0x492   :  { %4610 = vmatmul.mubr.msk.f32.gmra.mrb[10].mxu1 %vm226_vm5, %v4603_v45 }
 0x493   :  { %4646 = vmatprep.mubr.msk.f32.mxu1 %vm226_vm5, %v2127_v52 }
 0x496   :  { %4647 = vmatmul.mubr.msk.f32.vlgmr.msra.gmra.mrb[8].mxu1 %vm226_vm5, %v4640_v50 }
 0x497   :  { %4649 = vmatprep.mubr.msk.f32.mxu1 %vm226_vm5, %v2137_v37 }
 0x49a   :  { %4650 = vmatmul.mubr.msk.f32.gmra.mrb[10].mxu1 %vm226_vm5, %v4643_v32 }
 0x49b   :  { %4671 = vmatprep.mubr.msk.f32.mxu1 %vm5154_vm0, %v5155_v6 }
 0x569   :  { %v4648_v49 = vpop.f32.mrb[8].mxu1 }
 0x56a   :  { %v2256_v8 = vsel %vm2254_vm10, %v4648_v49, 0.0  ;;  %v2229_v53 = vpop.f32.mrb[9].mxu1 }
 0x56b   :  { %v2255_v9 = vsel %vm2254_vm10, %v2229_v53, 0.0 }
 0x56c   :  { %v2257_v57 = vadd.f32 %v2256_v8, %v2255_v9 }
 0x56d   :  { %v4651_v10 = vpop.f32.mrb[10].mxu1 }
 0x56e   :  { %v2239_v61 = vpop.f32.mrb[11].mxu1  ;;  %v2260_v13 = vsel %vm2254_vm10, %v4651_v10, 0.0 }
 0x56f   :  { %v2258_v12 = vsel %vm2254_vm10, %v2239_v61, 0.0 }
 0x570   :  { %v2259_v1 = vadd.f32 %v2258_v12, %v2257_v57 }
 0x572   :  { %v2261_v7 = vadd.f32 %v2260_v13, %v2259_v1 }
 0x574   :  { %v2262_v14 = vrot.slane %v2261_v7, 4 }
 0x576   :  { %v2263_v11 = vadd.f32 %v2262_v14, %v2261_v7 }
 0x578   :  { %v2264_v15 = vrot.slane %v2263_v11, 2 }
 0x57a   :  { %v2265_v17 = vadd.f32 %v2264_v15, %v2263_v11 }
 0x57c   :  { %v2266_v16 = vrot.slane %v2265_v17, 1 }
 0x57e   :  { %v2267_v18 = vadd.f32 %v2266_v16, %v2265_v17 }
 0x580   :  { %v2269_v19 = vmul.f32 0.03125, %v2267_v18 }
 0x582   :  { %v2270_v20 = vsub.f32 %v2229_v53, %v2269_v19  ;;  %v2271_v21 = vsub.f32 %v4648_v49, %v2269_v19  ;;  %v2272_v22 = vsub.f32 %v2239_v61, %v2269_v19  ;;  %v2273_v23 = vsub.f32 %v4651_v10, %v2269_v19 }
 0x584   :  { %v2274_v24 = vmul.f32 %v2270_v20, %v2270_v20  ;;  %v2275_v25 = vmul.f32 %v2271_v21, %v2271_v21  ;;  %v2276_v26 = vmul.f32 %v2272_v22, %v2272_v22  ;;  %v2277_v28 = vmul.f32 %v2273_v23, %v2273_v23 }
 0x586   :  { %v2278_v29 = vsel %vm2254_vm10, %v2274_v24, 0.0  ;;  %v2279_v31 = vsel %vm2254_vm10, %v2275_v25, 0.0  ;;  %v2281_v34 = vsel %vm2254_vm10, %v2276_v26, 0.0  ;;  %v2283_v36 = vsel %vm2254_vm10, %v2277_v28, 0.0 }
 0x587   :  { %v2280_v33 = vadd.f32 %v2279_v31, %v2278_v29 }
 0x589   :  { %v2282_v35 = vadd.f32 %v2281_v34, %v2280_v33 }
 0x58b   :  { %v2284_v38 = vadd.f32 %v2283_v36, %v2282_v35 }
 0x58d   :  { %v2285_v39 = vrot.slane %v2284_v38, 4 }
 0x58f   :  { %v2286_v40 = vadd.f32 %v2285_v39, %v2284_v38 }
 0x591   :  { %v2287_v51 = vrot.slane %v2286_v40, 2 }
 0x593   :  { %v2288_v54 = vadd.f32 %v2287_v51, %v2286_v40 }
 0x595   :  { %v2289_v55 = vrot.slane %v2288_v54, 1 }
 0x597   :  { %v2290_v56 = vadd.f32 %v2289_v55, %v2288_v54 }
 0x599   :  { %v2291_v58 = vmul.f32 0.03125, %v2290_v56 }
 0x59b   :  { %v2292_v59 = vadd.f32 1e-05, %v2291_v58 }
 0x59d   :  { %5121 = vrsqrt.f32 %v2292_v59 }
 0x5a7   :  { %v5122_v62 = vpop.eup %5121 }
 0x5a8   :  { %v2294_v63 = vmul.f32 %v5122_v62, %v2252_v60  ;;  %v2321_v60 = vld [vmem:[%s6021_s6 + $0x4] sm:$0x1] }
 0x5aa   :  { %v2298_v0 = vrot.slane %v2294_v63, %v5415_v47  ;;  %v2303_v2 = vmul.f32 %v2294_v63, %v2269_v19 }
 0x5ac   :  { %v2299_v30 = vmul.f32 %v2298_v0, %v2229_v53  ;;  %v2300_v42 = vmul.f32 %v4648_v49, %v2298_v0  ;;  %v2301_v43 = vmul.f32 %v2298_v0, %v2239_v61  ;;  %v2302_v44 = vmul.f32 %v4651_v10, %v2298_v0 }
 0x5ad   :  { %v2304_v46 = vsub.f32 %v2253_v27, %v2303_v2  ;;  %v2322_v27 = vld [vmem:[%s6021_s6 + $0x5] sm:$0x1] }
 0x5af   :  { %v2308_v48 = vrot.slane %v2304_v46, %v5415_v47 }
 0x5b1   :  { %v2309_v50 = vadd.f32 %v2308_v48, %v2299_v30  ;;  %v2310_v52 = vadd.f32 %v2308_v48, %v2300_v42  ;;  %v2311_v32 = vadd.f32 %v2308_v48, %v2301_v43  ;;  %v2312_v37 = vadd.f32 %v2308_v48, %v2302_v44 }
 0x5b3   :  { %v2313_v4 = vmul.f32 0.01, %v2309_v50  ;;  %v2314_v41 = vmul.f32 0.01, %v2310_v52  ;;  %v2315_v45 = vmul.f32 0.01, %v2311_v32 }
 0x5b4   :  { %v2316_v5 = vmul.f32 0.01, %v2312_v37 }
 0x5b5   :  { %v2317_v8 = vmax.f32 %v2309_v50, %v2313_v4  ;;  %v2318_v9 = vmax.f32 %v2310_v52, %v2314_v41  ;;  %v2319_v57 = vmax.f32 %v2311_v32, %v2315_v45  ;;  %v2380_v45 = vld [vmem:[%s6019_s4] sm:$0xff] }
 0x5b6   :  { %v2320_v12 = vmax.f32 %v2312_v37, %v2316_v5  ;;  %v3917_v5 = vld [vmem:[%s6020_s5 + $0x8] sm:$0xff] }
 0x5b7   :  { %v2323_v53 = vsel %vm2254_vm10, %v2317_v8, 0.0  ;;  %v2324_v49 = vsel %vm2254_vm10, %v2318_v9, 0.0  ;;  %v2326_v61 = vsel %vm2254_vm10, %v2319_v57, 0.0 }
 0x5b8   :  { %v2325_v10 = vadd.f32 %v2324_v49, %v2323_v53  ;;  %v2328_v13 = vsel %vm2254_vm10, %v2320_v12, 0.0  ;;  %v3920_v49 = vld [vmem:[%s6019_s4 + $0x10] sm:$0xff] }
 0x5ba   :  { %v2327_v1 = vadd.f32 %v2326_v61, %v2325_v10  ;;  %v3922_v10 = vld [vmem:[%s6020_s5 + $0x10] sm:$0xff] }
 0x5bc   :  { %v2329_v7 = vadd.f32 %v2328_v13, %v2327_v1 }
 0x5be   :  { %v2330_v14 = vrot.slane %v2329_v7, 4 }
 0x5c0   :  { %v2331_v11 = vadd.f32 %v2330_v14, %v2329_v7 }
 0x5c2   :  { %v2332_v15 = vrot.slane %v2331_v11, 2 }
 0x5c4   :  { %v2333_v17 = vadd.f32 %v2332_v15, %v2331_v11 }
 0x5c6   :  { %v2334_v16 = vrot.slane %v2333_v17, 1 }
 0x5c8   :  { %v2335_v18 = vadd.f32 %v2334_v16, %v2333_v17  ;;  %v3924_v17 = vld [vmem:[%s6019_s4 + $0x18] sm:$0xff] }
 0x5c9   :  { %v3926_v16 = vld [vmem:[%s6020_s5 + $0x18] sm:$0xff] }
 0x5ca   :  { %v2336_v19 = vmul.f32 0.03125, %v2335_v18 }
 0x5cc   :  { %v2337_v20 = vsub.f32 %v2317_v8, %v2336_v19  ;;  %v2338_v21 = vsub.f32 %v2318_v9, %v2336_v19  ;;  %v2339_v22 = vsub.f32 %v2319_v57, %v2336_v19  ;;  %v2340_v23 = vsub.f32 %v2320_v12, %v2336_v19 }
 0x5ce   :  { %v2341_v24 = vmul.f32 %v2337_v20, %v2337_v20  ;;  %v2342_v25 = vmul.f32 %v2338_v21, %v2338_v21  ;;  %v2343_v26 = vmul.f32 %v2339_v22, %v2339_v22  ;;  %v2344_v28 = vmul.f32 %v2340_v23, %v2340_v23  ;;  %v3928_v23 = vld [vmem:[%s6019_s4 + $0x20] sm:$0xff] }
 0x5d0   :  { %v2345_v29 = vsel %vm2254_vm10, %v2341_v24, 0.0  ;;  %v2346_v31 = vsel %vm2254_vm10, %v2342_v25, 0.0  ;;  %v2348_v34 = vsel %vm2254_vm10, %v2343_v26, 0.0  ;;  %v2350_v36 = vsel %vm2254_vm10, %v2344_v28, 0.0  ;;  %v3930_v24 = vld [vmem:[%s6020_s5 + $0x20] sm:$0xff] }
 0x5d1   :  { %v2347_v33 = vadd.f32 %v2346_v31, %v2345_v29 }
 0x5d3   :  { %v2349_v35 = vadd.f32 %v2348_v34, %v2347_v33  ;;  %v3932_v33 = vld [vmem:[%s6019_s4 + $0x28] sm:$0xff] }
 0x5d4   :  { %v3934_v34 = vld [vmem:[%s6020_s5 + $0x28] sm:$0xff] }
 0x5d5   :  { %v2351_v38 = vadd.f32 %v2350_v36, %v2349_v35 }
 0x5d7   :  { %v2352_v39 = vrot.slane %v2351_v38, 4 }
 0x5d9   :  { %v2353_v40 = vadd.f32 %v2352_v39, %v2351_v38 }
 0x5db   :  { %v2354_v51 = vrot.slane %v2353_v40, 2 }
 0x5dd   :  { %v2355_v54 = vadd.f32 %v2354_v51, %v2353_v40  ;;  %v3936_v51 = vld [vmem:[%s6019_s4 + $0x30] sm:$0xff] }
 0x5df   :  { %v2356_v55 = vrot.slane %v2355_v54, 1 }
 0x5e1   :  { %v2357_v56 = vadd.f32 %v2356_v55, %v2355_v54  ;;  %v3938_v54 = vld [vmem:[%s6020_s5 + $0x30] sm:$0xff] }
 0x5e3   :  { %v2358_v58 = vmul.f32 0.03125, %v2357_v56 }
 0x5e5   :  { %v2359_v59 = vadd.f32 1e-05, %v2358_v58 }
 0x5e7   :  { %5123 = vrsqrt.f32 %v2359_v59 }
 0x5f1   :  { %v5124_v62 = vpop.eup %5123 }
 0x5f2   :  { %v2361_v63 = vmul.f32 %v5124_v62, %v2321_v60  ;;  %v3940_v62 = vld [vmem:[%s6019_s4 + $0x38] sm:$0xff] }
 0x5f4   :  { %v2365_v0 = vrot.slane %v2361_v63, %v5415_v47  ;;  %v2370_v2 = vmul.f32 %v2361_v63, %v2336_v19  ;;  %v3942_v63 = vld [vmem:[%s6020_s5 + $0x38] sm:$0xff] }
 0x5f6   :  { %v2366_v30 = vmul.f32 %v2365_v0, %v2317_v8  ;;  %v2367_v42 = vmul.f32 %v2365_v0, %v2318_v9  ;;  %v2368_v43 = vmul.f32 %v2365_v0, %v2319_v57  ;;  %v2369_v44 = vmul.f32 %v2365_v0, %v2320_v12  ;;  %v2455_v8 = vld [vmem:[%s6020_s5] sm:$0xff] }
 0x5f7   :  { %v2371_v46 = vsub.f32 %v2322_v27, %v2370_v2 }
 0x5f9   :  { %v2375_v48 = vrot.slane %v2371_v46, %v5415_v47  ;;  %v3915_v47 = vld [vmem:[%s6019_s4 + $0x8] sm:$0xff] }
 0x5fb   :  { %v2376_v50 = vadd.f32 %v2375_v48, %v2366_v30  ;;  %v2377_v52 = vadd.f32 %v2375_v48, %v2367_v42  ;;  %v2378_v32 = vadd.f32 %v2375_v48, %v2368_v43  ;;  %v2379_v37 = vadd.f32 %v2375_v48, %v2369_v44  ;;  %v3944_v43 = vld [vmem:[%s6019_s4 + $0x40] sm:$0xff]  ;;  %s5157_s4 = smov [#allocation2]  }
 0x5fc   :  { %v3946_v44 = vld [vmem:[%s6020_s5 + $0x40] sm:$0xff]  ;;  %s3762_s5 = sshll.u32 %s5157_s4, 4  ;;  %s3763_s5 = int_to_ptr.vmem [resolvable:$true] %s3762_s5 }
 0x5fd   :  { %v5849_v4 = vpack.c.bf16 %v2377_v52, %v2376_v50  ;;  %v5851_v41 = vpack.c.bf16 %v2379_v37, %v2378_v32  ;;  %v3948_v32 = vld [vmem:[%s6021_s6 + $0x6] ss:$0 sm:$0xff]  ;;  %s5129_s6 = scalar_lea.vmem %s3763_s5, 32  ;;  %p5134_p1 = scmp.lt.s32.totalorder %s3763_s5, %s3763_s5 }
 0x5fe   :  { %p5130_p0 = scmp.ne.s32.totalorder %s3763_s5, %s5129_s6  ;;  %p5135_p2 = scmp.lt.s32.totalorder %s5129_s6, %s5129_s6 }
 0x5ff   :  { %5030 = vmatpush3.bf16.msra.mxu0 %v5849_v4  ;;  %5036 = vmatpush3.bf16.msra.mxu1 %v5849_v4 }
 0x600   :  { %5031 = vmatprep.subr.bf16.mxu0 %v5153_v3  ;;  %5037 = vmatprep.subr.bf16.mxu1 %v5153_v3  ;;  %p5136_p3 = por %p5135_p2, %p5134_p1 }
 0x602   :  { %p5137_p4 = pnand %p5136_p3, %p5130_p0 }
 0x603   :  { %5033 = vmatpush3.bf16.msra.mxu0 %v5851_v41  ;;  %5039 = vmatpush3.bf16.msra.mxu1 %v5851_v41 }
 0x604   :  { %4674 = vmatprep.subr.mxu0 %v5155_v6  ;;  %4679 = vmatprep.subr.mxu1 %v5155_v6 }
 0x606   :  { %4672 = vmatmul.mubr.msk.f32.vlgmr.msra.gmra.mrb[20].mxu1 %vm2381_vm11, %v3915_v47  ;;  %4661 = vmatmul.mubr.msk.f32.vlgmr.msra.gmra.mrb[46].mxu0 %vm2381_vm11, %v2380_v45 }
 0x607   :  { %4675 = vmatpush3.msra.mxu0 %v3917_v5  ;;  %4676 = vmatprep.mubr.msk.f32.mxu0 %vm5154_vm0, %v5155_v6 }
 0x608   :  { %5040 = vmatprep.subr.bf16.mxu0 %v5153_v3  ;;  %4681 = vmatprep.mubr.msk.f32.mxu1 %vm5154_vm0, %v5155_v6 }
 0x609   :  { %4680 = vmatpush3.msra.mxu1 %v2455_v8 }
 0x60a   :  { %4695 = vmatprep.subr.mxu1 %v5155_v6 }
 0x6d9   :  { %v2527_v9 = vpop.f32.mrb[20].mxu1  ;;  %v2451_v57 = vpop.f32.mrb[46].mxu0 }
 0x6da   :  { %4677 = vmatmul.mubr.msk.f32.vlgmr.msra.gmra.mrb[48].mxu0 %vm2254_vm10, %v2527_v9  ;;  %v4673_v12 = vpop.f32.mrb[21].mxu1  ;;  %4682 = vmatmul.mubr.msk.f32.vlgmr.msra.gmra.mrb[22].mxu1 %vm2254_vm10, %v2451_v57  ;;  %v4662_v53 = vpop.f32.mrb[47].mxu0 }
 0x6db   :  { %5042 = vmatpush3.bf16.msra.mxu0 %v5849_v4  ;;  %4692 = vmatprep.mubr.msk.f32.mxu0 %vm5154_vm0, %v5155_v6 }
 0x6dc   :  { %5043 = vmatprep.subr.bf16.mxu0 %v5153_v3  ;;  %4697 = vmatprep.mubr.msk.f32.mxu1 %vm5154_vm0, %v5155_v6 }
 0x6dd   :  { %4696 = vmatpush3.msra.mxu1 %v3922_v10 }
 0x6de   :  { %5046 = vmatprep.subr.bf16.mxu1 %v5153_v3 }
 0x6df   :  { %5045 = vmatpush3.bf16.msra.mxu0 %v5851_v41 }
 0x6e0   :  { %4711 = vmatprep.subr.mxu0 %v5155_v6 }
 0x6e2   :  { %4693 = vmatmul.mubr.msk.f32.vlgmr.msra.gmra.mrb[50].mxu0 %vm2381_vm11, %v3920_v49 }
 0x6e3   :  { %4713 = vmatprep.mubr.msk.f32.mxu0 %vm5154_vm0, %v5155_v6  ;;  %4712 = vmatpush3.msra.mxu0 %v3926_v16 }
 0x6e4   :  { %5052 = vmatprep.subr.bf16.mxu0 %v5153_v3 }
 0x7ad   :  { %v2602_v61 = vpop.f32.mrb[48].mxu0  ;;  %v2675_v1 = vpop.f32.mrb[22].mxu1 }
 0x7ae   :  { %v4678_v13 = vpop.f32.mrb[49].mxu0  ;;  %v2676_v7 = vadd.f32 %v2675_v1, %v2602_v61  ;;  %v4683_v14 = vpop.f32.mrb[23].mxu1 }
 0x7b5   :  { %v2750_v11 = vpop.f32.mrb[50].mxu0 }
 0x7b6   :  { %4698 = vmatmul.mubr.msk.f32.vlgmr.msra.gmra.mrb[24].mxu1 %vm2254_vm10, %v2750_v11  ;;  %v4694_v15 = vpop.f32.mrb[51].mxu0 }
 0x7b7   :  { %5048 = vmatpush3.bf16.msra.mxu1 %v5849_v4  ;;  %4708 = vmatprep.mubr.msk.f32.mxu1 %vm5154_vm0, %v5155_v6 }
 0x7b8   :  { %5049 = vmatprep.subr.bf16.mxu1 %v5153_v3 }
 0x7bb   :  { %5051 = vmatpush3.bf16.msra.mxu1 %v5851_v41 }
 0x7bc   :  { %4727 = vmatprep.subr.mxu1 %v5155_v6 }
 0x7be   :  { %4709 = vmatmul.mubr.msk.f32.vlgmr.msra.gmra.mrb[26].mxu1 %vm2381_vm11, %v3924_v17 }
 0x7bf   :  { %4729 = vmatprep.mubr.msk.f32.mxu1 %vm5154_vm0, %v5155_v6  ;;  %4728 = vmatpush3.msra.mxu1 %v3930_v24 }
 0x7c0   :  { %5058 = vmatprep.subr.bf16.mxu1 %v5153_v3 }
 0x889   :  { %v2825_v18 = vpop.f32.mrb[24].mxu1 }
 0x88a   :  { %v2829_v19 = vadd.f32 %v2825_v18, %v2676_v7  ;;  %v4699_v20 = vpop.f32.mrb[25].mxu1 }
 0x891   :  { %v2901_v21 = vpop.f32.mrb[26].mxu1 }
 0x892   :  { %4714 = vmatmul.mubr.msk.f32.vlgmr.msra.gmra.mrb[52].mxu0 %vm2254_vm10, %v2901_v21  ;;  %v4710_v22 = vpop.f32.mrb[27].mxu1 }
 0x893   :  { %5054 = vmatpush3.bf16.msra.mxu0 %v5849_v4  ;;  %4724 = vmatprep.mubr.msk.f32.mxu0 %vm5154_vm0, %v5155_v6 }
 0x894   :  { %5055 = vmatprep.subr.bf16.mxu0 %v5153_v3 }
 0x897   :  { %5057 = vmatpush3.bf16.msra.mxu0 %v5851_v41 }
 0x898   :  { %4743 = vmatprep.subr.mxu0 %v5155_v6 }
 0x89a   :  { %4725 = vmatmul.mubr.msk.f32.vlgmr.msra.gmra.mrb[54].mxu0 %vm2381_vm11, %v3928_v23 }
 0x89b   :  { %4745 = vmatprep.mubr.msk.f32.mxu0 %vm5154_vm0, %v5155_v6  ;;  %4744 = vmatpush3.msra.mxu0 %v3934_v34 }
 0x89c   :  { %5064 = vmatprep.subr.bf16.mxu0 %v5153_v3 }
 0x965   :  { %v2976_v25 = vpop.f32.mrb[52].mxu0 }
 0x966   :  { %v2980_v26 = vadd.f32 %v2976_v25, %v2829_v19  ;;  %v4715_v28 = vpop.f32.mrb[53].mxu0 }
 0x96d   :  { %v3052_v29 = vpop.f32.mrb[54].mxu0 }
 0x96e   :  { %4730 = vmatmul.mubr.msk.f32.vlgmr.msra.gmra.mrb[28].mxu1 %vm2254_vm10, %v3052_v29  ;;  %v4726_v31 = vpop.f32.mrb[55].mxu0 }
 0x96f   :  { %5060 = vmatpush3.bf16.msra.mxu1 %v5849_v4  ;;  %4740 = vmatprep.mubr.msk.f32.mxu1 %vm5154_vm0, %v5155_v6 }
 0x970   :  { %5061 = vmatprep.subr.bf16.mxu1 %v5153_v3 }
 0x973   :  { %5063 = vmatpush3.bf16.msra.mxu1 %v5851_v41 }
 0x974   :  { %4759 = vmatprep.subr.mxu1 %v5155_v6 }
 0x976   :  { %4741 = vmatmul.mubr.msk.f32.vlgmr.msra.gmra.mrb[30].mxu1 %vm2381_vm11, %v3932_v33 }
 0x977   :  { %4761 = vmatprep.mubr.msk.f32.mxu1 %vm5154_vm0, %v5155_v6  ;;  %4760 = vmatpush3.msra.mxu1 %v3938_v54 }
 0x978   :  { %5070 = vmatprep.subr.bf16.mxu1 %v5153_v3 }
 0xa41   :  { %v3127_v35 = vpop.f32.mrb[28].mxu1 }
 0xa42   :  { %v3131_v36 = vadd.f32 %v3127_v35, %v2980_v26  ;;  %v4731_v38 = vpop.f32.mrb[29].mxu1 }
 0xa49   :  { %v3203_v39 = vpop.f32.mrb[30].mxu1 }
 0xa4a   :  { %4746 = vmatmul.mubr.msk.f32.vlgmr.msra.gmra.mrb[56].mxu0 %vm2254_vm10, %v3203_v39  ;;  %v4742_v40 = vpop.f32.mrb[31].mxu1 }
 0xa4b   :  { %5066 = vmatpush3.bf16.msra.mxu0 %v5849_v4  ;;  %4756 = vmatprep.mubr.msk.f32.mxu0 %vm5154_vm0, %v5155_v6 }
 0xa4c   :  { %5067 = vmatprep.subr.bf16.mxu0 %v5153_v3 }
 0xa4f   :  { %5069 = vmatpush3.bf16.msra.mxu0 %v5851_v41 }
 0xa50   :  { %4775 = vmatprep.subr.mxu0 %v5155_v6 }
 0xa52   :  { %4757 = vmatmul.mubr.msk.f32.vlgmr.msra.gmra.mrb[58].mxu0 %vm2381_vm11, %v3936_v51 }
 0xa53   :  { %4777 = vmatprep.mubr.msk.f32.mxu0 %vm5154_vm0, %v5155_v6  ;;  %4776 = vmatpush3.msra.mxu0 %v3942_v63 }
 0xa54   :  { %5076 = vmatprep.subr.bf16.mxu0 %v5153_v3 }
 0xb1d   :  { %v3278_v55 = vpop.f32.mrb[56].mxu0 }
 0xb1e   :  { %v3282_v56 = vadd.f32 %v3278_v55, %v3131_v36  ;;  %v4747_v58 = vpop.f32.mrb[57].mxu0 }
 0xb25   :  { %v3354_v59 = vpop.f32.mrb[58].mxu0 }
 0xb26   :  { %4762 = vmatmul.mubr.msk.f32.vlgmr.msra.gmra.mrb[32].mxu1 %vm2254_vm10, %v3354_v59  ;;  %v4758_v60 = vpop.f32.mrb[59].mxu0 }
 0xb27   :  { %5072 = vmatpush3.bf16.msra.mxu1 %v5849_v4  ;;  %4772 = vmatprep.mubr.msk.f32.mxu1 %vm5154_vm0, %v5155_v6 }
 0xb28   :  { %5073 = vmatprep.subr.bf16.mxu1 %v5153_v3 }
 0xb2b   :  { %5075 = vmatpush3.bf16.msra.mxu1 %v5851_v41 }
 0xb2c   :  { %4791 = vmatprep.subr.mxu1 %v5155_v6 }
 0xb2e   :  { %4773 = vmatmul.mubr.msk.f32.vlgmr.msra.gmra.mrb[34].mxu1 %vm2381_vm11, %v3940_v62 }
 0xb2f   :  { %4793 = vmatprep.mubr.msk.f32.mxu1 %vm5154_vm0, %v5155_v6  ;;  %4792 = vmatpush3.msra.mxu1 %v3946_v44 }
 0xbf9   :  { %v3429_v27 = vpop.f32.mrb[32].mxu1 }
 0xbfa   :  { %v3433_v0 = vadd.f32 %v3429_v27, %v3282_v56  ;;  %v4763_v2 = vpop.f32.mrb[33].mxu1 }
 0xc01   :  { %v3505_v30 = vpop.f32.mrb[34].mxu1 }
 0xc02   :  { %4778 = vmatmul.mubr.msk.f32.vlgmr.msra.gmra.mrb[60].mxu0 %vm2254_vm10, %v3505_v30  ;;  %v4774_v42 = vpop.f32.mrb[35].mxu1 }
 0xc03   :  { %5078 = vmatpush3.bf16.msra.mxu0 %v5849_v4  ;;  %4788 = vmatprep.mubr.msk.f32.mxu0 %vm5154_vm0, %v5155_v6 }
 0xc04   :  { %5079 = vmatprep.subr.bf16.mxu0 %v5153_v3 }
 0xc07   :  { %5081 = vmatpush3.bf16.msra.mxu0 %v5851_v41 }
 0xc0a   :  { %4789 = vmatmul.mubr.msk.f32.vlgmr.msra.gmra.mrb[62].mxu0 %vm2381_vm11, %v3944_v43 }
 0xcd5   :  { %v3580_v46 = vpop.f32.mrb[60].mxu0 }
 0xcd6   :  { %v3584_v48 = vadd.f32 %v3580_v46, %v3433_v0  ;;  %v4779_v50 = vpop.f32.mrb[61].mxu0 }
 0xcdd   :  { %v3656_v52 = vpop.f32.mrb[62].mxu0 }
 0xcde   :  { %4794 = vmatmul.mubr.msk.f32.vlgmr.msra.gmra.mrb[36].mxu1 %vm2254_vm10, %v3656_v52  ;;  %v4790_v3 = vpop.f32.mrb[63].mxu0 }
 0xdb1   :  { %v3731_v6 = vpop.f32.mrb[36].mxu1 }
 0xdb2   :  { %v3735_v37 = vadd.f32 %v3731_v6, %v3584_v48  ;;  %v4795_v4 = vpop.f32.mrb[37].mxu1 }
 0xdb4   :  { %v3741_v41 = vadd.f32 %v3948_v32, %v3735_v37 }
 0xdb6   :  { %v3743_v47 = vsel %vm3742_vm12, %v3741_v41, -inf }
 0xdb7   :  { %3744 = vmax.xlane.f32.xlu0 %v3743_v47 }
 0xe44   :  { %v3745_v45 = vpop.xlane.xlu0 %3744 }
 0xe45   :  { %v3746_v5 = vsub.f32 %v3741_v41, %v3745_v45 }
 0xe47   :  { %v3747_v8 = vmul.f32 1.442695, %v3746_v5 }
 0xe49   :  { %5125 = vpow2.f32 %v3747_v8 }
 0xe53   :  { %v5126_v9 = vpop.eup %5125 }
 0xe54   :  { %v3749_v57 = vsel %vm3742_vm12, %v5126_v9, 0.0 }
 0xe55   :  { %3750 = vadd.xlane.f32.xlu0 %v3749_v57 }
 0xee2   :  { %v3751_v12 = vpop.xlane.xlu0 %3750 }
 0xee3   :  { %5127 = vrcp.f32 %v3751_v12 }
 0xeed   :  { %v5128_v53 = vpop.eup %5127 }
 0xeee   :  { %v3753_v49 = vmul.f32 %v5128_v53, %v5126_v9 }
 0xef0   :  { %3755 = vst.msk [vmem:[#allocation2] sm:$0x3] %vm3754_vm13, %v3753_v49 }
 0xef1   :  { %5140 = shalt.err (!%p5137_p4)
}
 0xef2   :  { %s5141_s11 = scalar_lea.hbm %s6022_s7, 32 }
 0xef3   :  { %p5142_p5 = scmp.ne.s32.totalorder %s6022_s7, %s5141_s11  ;;  %p5145_p6 = scmp.lt.u32.totalorder %s5141_s11, %s6022_s7 }
 0xef5   :  { %p5147_p7 = pnand %p5145_p6, %p5142_p5 }
 0xef7   :  { %5150 = shalt.err (!%p5147_p7)
}
 0xef8   :  { %3765 = dma.vmem_to_hbm [thread:$0]  %s3763_s5, 32, %s6022_s7, [#allocation3]  }
 0xef9   :  { %5151 = dma.done.wait [#allocation3], 32  }
 0xefa   :  { %5152 = vsyncadd [#allocation3], 4294967264 }
 0xefb   :  { %3769 = vsyncpa [#allocation3], 1 }

</bundles_post_ra>
